<compile_context>
chip_gen: v5e
topology: v5e:2x2
jax: 0.10.0
libtpu: 0.0.40
codegen_flags: <defaults>
</compile_context>

<pallas_src>
import functools

import jax
import jax.numpy as jnp
from jax import lax
from jax.experimental import pallas as pl
from jax.experimental.pallas import tpu as pltpu

TEMPERATURE = 0.05
BASE_TEMPERATURE = 0.05
_NEG_LARGE = -1e30                       # Python float (NOT a traced jnp constant)
_RESIDENT_K_BUDGET = 20 * 1024 * 1024    # bytes, counting worst-case 2x buffering
_VMEM_LIMIT_BYTES = 48 * 1024 * 1024     # <= v7x 64 MiB physical per TensorCore


def _round_up(x, m):
    return (x + m - 1) // m * m


def _supcon_kernel(q_ref, k_ref, lbl_r_ref, lbl_c_ref, loss_ref,
                   m_sc, l_sc, sp_sc, cp_sc,
                   *, inv_temp, loss_scale, n_valid, tn, resident_k):
    """One (row-tile i, col-tile j) step of the online SupCon reduction."""
    i = pl.program_id(0)
    j = pl.program_id(1)
    nj = pl.num_programs(1)
    tm = q_ref.shape[0]

    @pl.when(j == 0)
    def _():
        m_sc[...] = jnp.full_like(m_sc, _NEG_LARGE)
        l_sc[...] = jnp.zeros_like(l_sc)
        sp_sc[...] = jnp.zeros_like(sp_sc)
        cp_sc[...] = jnp.zeros_like(cp_sc)

    if resident_k:
        # K lives fully in VMEM; slice the current column tile out of it.
        kv = k_ref[pl.ds(pl.multiple_of(j * tn, tn), tn), :]
    else:
        kv = k_ref[...]

    # Scaled logits tile: bf16 (or f32) MXU matmul with f32 accumulation; the
    # 1/T scale is a single f32 VPU mul on the result (no q cast round-trip).
    s = lax.dot_general(q_ref[...], kv, (((1,), (1,)), ((), ())),
                        preferred_element_type=jnp.float32) * inv_temp   # [tm, tn]

    lbl_eq = lbl_r_ref[...] == lbl_c_ref[...]        # [tm, tn] label-match (pre diag/pad)

    # Fast path: interior tiles (no diagonal entries, no padded columns) skip the
    # iota / validity / diagonal mask plumbing entirely.
    row_lo = i * tm
    col_lo = j * tn
    has_diag = jnp.logical_and(row_lo < col_lo + tn, col_lo < row_lo + tm)
    has_pad = (col_lo + tn) > n_valid
    needs_mask = jnp.logical_or(has_diag, has_pad)

    def _edge_tile(_):
        row_idx = row_lo + lax.broadcasted_iota(jnp.int32, (tm, tn), 0)
        col_idx = col_lo + lax.broadcasted_iota(jnp.int32, (tm, tn), 1)
        col_valid = col_idx < n_valid
        keep = jnp.logical_and(col_valid, row_idx != col_idx)
        s_max = jnp.where(col_valid, s, _NEG_LARGE)   # running max includes diag (as reference)
        s_den = jnp.where(keep, s, _NEG_LARGE)        # softmax denom excludes diag + padding
        posf = jnp.logical_and(lbl_eq, keep).astype(jnp.float32)
        return s_max, s_den, posf

    def _interior_tile(_):
        return s, s, lbl_eq.astype(jnp.float32)

    s_max, s_den, posf = lax.cond(needs_mask, _edge_tile, _interior_tile, None)

    # Online logsumexp (non-diagonal denominator) + linear positive accumulators.
    m_new = jnp.maximum(m_sc[...], jnp.max(s_max, axis=1, keepdims=True))
    alpha = jnp.exp(m_sc[...] - m_new)
    p = jnp.exp(s_den - m_new)
    l_sc[...] = alpha * l_sc[...] + jnp.sum(p, axis=1, keepdims=True)
    m_sc[...] = m_new
    sp_sc[...] += jnp.sum(posf * s, axis=1, keepdims=True)   # sum(mask * logits)
    cp_sc[...] += jnp.sum(posf, axis=1, keepdims=True)       # sum(mask)

    @pl.when(j == nj - 1)
    def _():
        # sum(mask*log_prob) = sum(mask*logits) - logsumexp_nondiag * sum(mask)
        log_denom = m_sc[...] + jnp.log(l_sc[...])
        c = cp_sc[...]
        mean_log_prob_pos = (sp_sc[...] - log_denom * c) / c  # [tm, 1]
        row_valid = (row_lo + lax.broadcasted_iota(jnp.int32, (tm, 1), 0)) < n_valid
        per_row = jnp.where(row_valid, -loss_scale * mean_log_prob_pos, 0.0)
        loss_ref[...] = per_row.astype(loss_ref.dtype)


def supcon_loss(features, labels=None, mask=None,
                temperature=TEMPERATURE, base_temperature=BASE_TEMPERATURE,
                contrast_mode="all", matmul_dtype=jnp.bfloat16):
    """Pallas implementation of SupConLoss.forward (contrast_mode='all').

    Default matmul_dtype=bfloat16 drives the MXU natively (f32 accumulation) and
    halves DMA bytes; pass jnp.float32 for tight parity with the f32 reference.
    """
    if features.ndim < 3:
        raise ValueError("`features` needs to be [bsz, n_views, ...]")
    if features.ndim > 3:
        features = features.reshape(features.shape[0], features.shape[1], -1)
    if contrast_mode != "all":
        # TODO(synk): contrast_mode='one' (anchor = view 0 only) not implemented.
        raise ValueError("only contrast_mode='all' implemented")
    bsz, n_views, dim = features.shape

    if labels is not None and mask is not None:
        raise ValueError("Cannot define both `labels` and `mask`")
    if mask is not None:
        # TODO(synk): explicit (possibly asymmetric) bsz x bsz `mask` argument is
        # not supported by the label-compare tiled kernel.
        raise NotImplementedError("explicit `mask` not supported; pass `labels`")
    if labels is None:
        # SimCLR degenerate case: mask = eye(bsz)  <=>  every sample its own class.
        labels = jnp.arange(bsz, dtype=jnp.int32)
    else:
        labels = labels.reshape(-1).astype(jnp.int32)
        if labels.shape[0] != bsz:
            raise ValueError("Num of labels does not match num of features")

    n = n_views * bsz
    # contrast_feature = cat(unbind(features, dim=1), dim=0) -> [N, D]
    feat = jnp.transpose(features, (1, 0, 2)).reshape(n, dim)
    lbl_full = jnp.tile(labels, n_views)  # [N]

    # Lane-dense padding: D -> mult of 128; N -> padded straight up to the column
    # tile so the col tile never degrades to 128 for awkward N.
    d_pad = _round_up(dim, 128)
    if n <= 128:
        tn = 128
    elif n <= 4096:
        tn = 256
    else:
        tn = 512
    n_pad = _round_up(n, tn)
    # tm=256 feeds the 256-wide MXU on v6e/v7x; keep >= 2 row tiles so the
    # "parallel" row axis can still shard across v7x's two TensorCores.
    tm = 256 if (n_pad % 256 == 0 and n_pad // 256 >= 2) else 128

    mdt = jnp.dtype(matmul_dtype)
    feat_p = jnp.zeros((n_pad, d_pad), mdt).at[:n, :dim].set(feat.astype(mdt))
    lbl_p = jnp.zeros((n_pad,), jnp.int32).at[:n].set(lbl_full)
    lbl_row = lbl_p.reshape(n_pad, 1)   # broadcast down rows
    lbl_col = lbl_p.reshape(1, n_pad)   # broadcast across columns

    # Resident K when the whole padded feature matrix fits a conservative VMEM
    # budget (counting worst-case 2x buffering). Otherwise stream K tiles with a
    # 3-deep pipeline to hide per-step DMA latency.
    resident_k = (2 * n_pad * d_pad * mdt.itemsize) <= _RESIDENT_K_BUDGET
    if resident_k:
        k_spec = pl.BlockSpec((n_pad, d_pad), lambda i, j: (0, 0))
    else:
        k_spec = pl.BlockSpec((tn, d_pad), lambda i, j: (j, 0),
                              pipeline_mode=pl.Buffered(3))

    kernel = functools.partial(
        _supcon_kernel,
        inv_temp=float(1.0 / temperature),
        loss_scale=float(temperature / base_temperature),
        n_valid=int(n),
        tn=int(tn),
        resident_k=resident_k,
    )

    per_row = pl.pallas_call(
        kernel,
        out_shape=jax.ShapeDtypeStruct((n_pad, 1), jnp.float32),
        grid_spec=pltpu.PrefetchScalarGridSpec(
            num_scalar_prefetch=0,
            grid=(n_pad // tm, n_pad // tn),
            in_specs=[
                pl.BlockSpec((tm, d_pad), lambda i, j: (i, 0)),  # q row tile
                k_spec,                                           # K (resident or tiled)
                pl.BlockSpec((tm, 1), lambda i, j: (i, 0)),       # row labels
                pl.BlockSpec((1, tn), lambda i, j: (0, j)),       # col labels
            ],
            out_specs=pl.BlockSpec((tm, 1), lambda i, j: (i, 0)),
            scratch_shapes=[pltpu.VMEM((tm, 1), jnp.float32)] * 4,  # m, l, sum_pos, cnt_pos
        ),
        compiler_params=pltpu.CompilerParams(
            dimension_semantics=("parallel", "arbitrary"),
            vmem_limit_bytes=_VMEM_LIMIT_BYTES),
    )(feat_p, feat_p, lbl_row, lbl_col)

    # Padded rows contribute exactly 0; mean over the N real anchor rows.
    return jnp.sum(per_row) / n


def _supcon_loss_ref(features, labels, temperature=TEMPERATURE,
                     base_temperature=BASE_TEMPERATURE):
    """Pure-JAX f32 reference mirroring the torch code (contrast_mode='all')."""
    bsz, n_views, dim = features.shape
    base_mask = (labels.reshape(-1, 1) == labels.reshape(1, -1)).astype(jnp.float32)
    feat = jnp.transpose(features, (1, 0, 2)).reshape(n_views * bsz, dim)
    logits = feat @ feat.T / temperature
    logits = logits - jnp.max(logits, axis=1, keepdims=True)
    n = n_views * bsz
    logits_mask = 1.0 - jnp.eye(n, dtype=jnp.float32)
    msk = jnp.tile(base_mask, (n_views, n_views)) * logits_mask
    exp_logits = jnp.exp(logits) * logits_mask
    log_prob = logits - jnp.log(exp_logits.sum(1, keepdims=True))
    mean_log_prob_pos = (msk * log_prob).sum(1) / msk.sum(1)
    loss = -(temperature / base_temperature) * mean_log_prob_pos
    return loss.mean()


if __name__ == "__main__":
    key = jax.random.PRNGKey(0)
    k_feat, k_lab, k_feat2, k_lab2 = jax.random.split(key, 4)

    # --- small case (single tile after padding) ---
    bsz, n_views, dim = 8, 2, 32
    features = jax.random.normal(k_feat, (bsz, n_views, dim), dtype=jnp.float32)
    features = features / jnp.linalg.norm(features, axis=-1, keepdims=True)
    labels = jax.random.randint(k_lab, (bsz,), 0, 3)

    ref = _supcon_loss_ref(features, labels)

    # Default bf16 MXU path (looser tolerance vs f32 reference).
    loss_bf16 = jax.block_until_ready(supcon_loss(features, labels=labels))
    assert jnp.allclose(loss_bf16, ref, rtol=5e-2, atol=5e-2), (loss_bf16, ref)

    # f32 path: tight parity with the reference math.
    loss_f32 = jax.block_until_ready(
        supcon_loss(features, labels=labels, matmul_dtype=jnp.float32))
    assert jnp.allclose(loss_f32, ref, rtol=1e-4, atol=1e-4), (loss_f32, ref)

    # SimCLR path (labels=None -> eye mask == labels=arange)
    loss_u = jax.block_until_ready(supcon_loss(features, matmul_dtype=jnp.float32))
    ref_u = _supcon_loss_ref(features, jnp.arange(bsz))
    assert jnp.allclose(loss_u, ref_u, rtol=1e-4, atol=1e-4), (loss_u, ref_u)

    # --- larger case: N=300 -> n_pad=512, tm=tn=256 -> 2x2 grid; exercises the
    # interior fast path, diagonal tiles, column padding, and row padding.
    bsz2, n_views2, dim2 = 150, 2, 40
    feats2 = jax.random.normal(k_feat2, (bsz2, n_views2, dim2), dtype=jnp.float32)
    feats2 = feats2 / jnp.linalg.norm(feats2, axis=-1, keepdims=True)
    labels2 = jax.random.randint(k_lab2, (bsz2,), 0, 10)

    ref2 = _supcon_loss_ref(feats2, labels2)
    loss2_bf16 = jax.block_until_ready(supcon_loss(feats2, labels=labels2))
    assert jnp.allclose(loss2_bf16, ref2, rtol=5e-2, atol=5e-2), (loss2_bf16, ref2)
    loss2_f32 = jax.block_until_ready(
        supcon_loss(feats2, labels=labels2, matmul_dtype=jnp.float32))
    assert jnp.allclose(loss2_f32, ref2, rtol=1e-4, atol=1e-4), (loss2_f32, ref2)

    print("KERNEL_OK")
</pallas_src>

<mosaic_0001>
module attributes {stable_mosaic.version = 11 : i64} {
  func.func @_supcon_kernel(%arg0: i32, %arg1: i32, %arg2: memref<128x128xbf16, #tpu.memory_space<vmem>>, %arg3: memref<128x128xbf16, #tpu.memory_space<vmem>>, %arg4: memref<128x1xi32, #tpu.memory_space<vmem>>, %arg5: memref<1x128xi32, #tpu.memory_space<vmem>>, %arg6: memref<128x1xf32, #tpu.memory_space<vmem>>, %arg7: memref<128x1xf32, #tpu.memory_space<vmem>>, %arg8: memref<128x1xf32, #tpu.memory_space<vmem>>, %arg9: memref<128x1xf32, #tpu.memory_space<vmem>>, %arg10: memref<128x1xf32, #tpu.memory_space<vmem>>) attributes {dimension_semantics = [#tpu.dimension_semantics<parallel>, #tpu.dimension_semantics<arbitrary>], iteration_bounds = array<i64: 1, 1>, scalar_prefetch = 0 : i64, scratch_operands = 4 : i64, tpu.core_type = #tpu.core_type<tc>, window_params = [{transform_indices = @transform_0, window_bounds = array<i64: 128, 128>}, {pipeline_mode = #tpu.pipeline_mode<synchronous>, transform_indices = @transform_1, window_bounds = array<i64: 128, 128>}, {transform_indices = @transform_2, window_bounds = array<i64: 128, 1>}, {transform_indices = @transform_3, window_bounds = array<i64: 1, 128>}, {transform_indices = @transform_4, window_bounds = array<i64: 128, 1>}]} {
    %c0_i32 = arith.constant 0 : i32
    %0 = arith.cmpi eq, %arg1, %c0_i32 : i32
    %1 = arith.extui %0 : i1 to i32
    %c0_i32_0 = arith.constant 0 : i32
    %2 = arith.cmpi ne, %1, %c0_i32_0 : i32
    scf.if %2 {
      %cst_38 = arith.constant -1.000000e+30 : f32
      %60 = vector.broadcast %cst_38 : f32 to vector<128x1xf32>
      %c0_39 = arith.constant 0 : index
      %c0_40 = arith.constant 0 : index
      %61 = vector.load %arg7[%c0_39, %c0_40] : memref<128x1xf32, #tpu.memory_space<vmem>>, vector<128x1xf32>
      tpu.vector_store %arg7[%c0_39, %c0_40], %60 {strides = array<i32>} : memref<128x1xf32, #tpu.memory_space<vmem>>, vector<128x1xf32>,
      %cst_41 = arith.constant 0.000000e+00 : f32
      %62 = vector.broadcast %cst_41 : f32 to vector<128x1xf32>
      %c0_42 = arith.constant 0 : index
      %c0_43 = arith.constant 0 : index
      %63 = vector.load %arg8[%c0_42, %c0_43] : memref<128x1xf32, #tpu.memory_space<vmem>>, vector<128x1xf32>
      tpu.vector_store %arg8[%c0_42, %c0_43], %62 {strides = array<i32>} : memref<128x1xf32, #tpu.memory_space<vmem>>, vector<128x1xf32>,
      %cst_44 = arith.constant 0.000000e+00 : f32
      %64 = vector.broadcast %cst_44 : f32 to vector<128x1xf32>
      %c0_45 = arith.constant 0 : index
      %c0_46 = arith.constant 0 : index
      %65 = vector.load %arg9[%c0_45, %c0_46] : memref<128x1xf32, #tpu.memory_space<vmem>>, vector<128x1xf32>
      tpu.vector_store %arg9[%c0_45, %c0_46], %64 {strides = array<i32>} : memref<128x1xf32, #tpu.memory_space<vmem>>, vector<128x1xf32>,
      %cst_47 = arith.constant 0.000000e+00 : f32
      %66 = vector.broadcast %cst_47 : f32 to vector<128x1xf32>
      %c0_48 = arith.constant 0 : index
      %c0_49 = arith.constant 0 : index
      %67 = vector.load %arg10[%c0_48, %c0_49] : memref<128x1xf32, #tpu.memory_space<vmem>>, vector<128x1xf32>
      tpu.vector_store %arg10[%c0_48, %c0_49], %66 {strides = array<i32>} : memref<128x1xf32, #tpu.memory_space<vmem>>, vector<128x1xf32>,
    } else {
    }
    %c128_i32 = arith.constant 128 : i32
    %3 = arith.muli %arg1, %c128_i32 : i32
    %4 = tpu.assume_multiple %3, 128 : i32
    %5 = arith.index_cast %4 : i32 to index
    %c0 = arith.constant 0 : index
    %6 = vector.load %arg3[%5, %c0] : memref<128x128xbf16, #tpu.memory_space<vmem>>, vector<128x128xbf16>
    %c0_1 = arith.constant 0 : index
    %c0_2 = arith.constant 0 : index
    %7 = vector.load %arg2[%c0_1, %c0_2] : memref<128x128xbf16, #tpu.memory_space<vmem>>, vector<128x128xbf16>
    %cst = arith.constant dense<0.000000e+00> : vector<128x128xf32>
    %8 = tpu.matmul %7, %6, %cst {dimension_numbers = #tpu.dot_dimension_numbers<[1], [1], [0], [0], [0, 0, 1, 0], [], []>} : vector<128x128xbf16>, vector<128x128xbf16>, vector<128x128xf32> -> vector<128x128xf32>
    %cst_3 = arith.constant 2.000000e+01 : f32
    %9 = vector.broadcast %cst_3 : f32 to vector<128x128xf32>
    %10 = arith.mulf %8, %9 : vector<128x128xf32>
    %c0_4 = arith.constant 0 : index
    %c0_5 = arith.constant 0 : index
    %11 = vector.load %arg4[%c0_4, %c0_5] : memref<128x1xi32, #tpu.memory_space<vmem>>, vector<128x1xi32>
    %c0_6 = arith.constant 0 : index
    %c0_7 = arith.constant 0 : index
    %12 = vector.load %arg5[%c0_6, %c0_7] : memref<1x128xi32, #tpu.memory_space<vmem>>, vector<1x128xi32>
    %13 = vector.broadcast %11 : vector<128x1xi32> to vector<128x128xi32>
    %14 = vector.broadcast %12 : vector<1x128xi32> to vector<128x128xi32>
    %15 = arith.cmpi eq, %13, %14 : vector<128x128xi32>
    %c128_i32_8 = arith.constant 128 : i32
    %16 = arith.muli %arg0, %c128_i32_8 : i32
    %c128_i32_9 = arith.constant 128 : i32
    %17 = arith.muli %arg1, %c128_i32_9 : i32
    %c128_i32_10 = arith.constant 128 : i32
    %18 = arith.addi %17, %c128_i32_10 : i32
    %19 = arith.cmpi slt, %16, %18 : i32
    %c128_i32_11 = arith.constant 128 : i32
    %20 = arith.addi %16, %c128_i32_11 : i32
    %21 = arith.cmpi slt, %17, %20 : i32
    %22 = arith.andi %19, %21 : i1
    %c128_i32_12 = arith.constant 128 : i32
    %23 = arith.addi %17, %c128_i32_12 : i32
    %c16_i32 = arith.constant 16 : i32
    %24 = arith.cmpi sgt, %23, %c16_i32 : i32
    %25 = arith.ori %22, %24 : i1
    %26 = arith.extui %25 : i1 to i32
    %c0_i32_13 = arith.constant 0 : i32
    %27 = arith.cmpi ne, %26, %c0_i32_13 : i32
    %28:3 = scf.if %27 -> (vector<128x128xf32>, vector<128x128xf32>, vector<128x128xf32>) {
      %60 = tpu.iota {dimensions = array<i32: 0>} : vector<128x128xi32>
      %61 = vector.broadcast %16 : i32 to vector<128x128xi32>
      %62 = arith.addi %61, %60 : vector<128x128xi32>
      %63 = tpu.iota {dimensions = array<i32: 1>} : vector<128x128xi32>
      %64 = vector.broadcast %17 : i32 to vector<128x128xi32>
      %65 = arith.addi %64, %63 : vector<128x128xi32>
      %c16_i32_38 = arith.constant 16 : i32
      %66 = vector.broadcast %c16_i32_38 : i32 to vector<128x128xi32>
      %67 = arith.cmpi slt, %65, %66 : vector<128x128xi32>
      %68 = arith.cmpi ne, %62, %65 : vector<128x128xi32>
      %69 = arith.andi %67, %68 : vector<128x128xi1>
      %cst_39 = arith.constant -1.000000e+30 : f32
      %70 = vector.broadcast %cst_39 : f32 to vector<128x128xf32>
      %71 = arith.select %67, %10, %70 : vector<128x128xi1>, vector<128x128xf32>
      %cst_40 = arith.constant -1.000000e+30 : f32
      %72 = vector.broadcast %cst_40 : f32 to vector<128x128xf32>
      %73 = arith.select %69, %10, %72 : vector<128x128xi1>, vector<128x128xf32>
      %74 = arith.andi %15, %69 : vector<128x128xi1>
      %75 = arith.extui %74 : vector<128x128xi1> to vector<128x128xi32>
      %76 = arith.sitofp %75 : vector<128x128xi32> to vector<128x128xf32>
      scf.yield %71, %73, %76 : vector<128x128xf32>, vector<128x128xf32>, vector<128x128xf32>
    } else {
      %60 = arith.extui %15 : vector<128x128xi1> to vector<128x128xi32>
      %61 = arith.sitofp %60 : vector<128x128xi32> to vector<128x128xf32>
      scf.yield %10, %10, %61 : vector<128x128xf32>, vector<128x128xf32>, vector<128x128xf32>
    }
    %c0_14 = arith.constant 0 : index
    %c0_15 = arith.constant 0 : index
    %29 = vector.load %arg7[%c0_14, %c0_15] : memref<128x1xf32, #tpu.memory_space<vmem>>, vector<128x1xf32>
    %cst_16 = arith.constant dense<0xFF800000> : vector<128xf32>
    %30 = vector.multi_reduction <maximumf>, %28#0, %cst_16 [1] : vector<128x128xf32> to vector<128xf32>
    %31 = vector.shape_cast %30 : vector<128xf32> to vector<128x1xf32>
    %32 = arith.maximumf %29, %31 : vector<128x1xf32>
    %c0_17 = arith.constant 0 : index
    %c0_18 = arith.constant 0 : index
    %33 = vector.load %arg7[%c0_17, %c0_18] : memref<128x1xf32, #tpu.memory_space<vmem>>, vector<128x1xf32>
    %34 = arith.subf %33, %32 : vector<128x1xf32>
    %35 = math.exp %34 : vector<128x1xf32>
    %36 = vector.broadcast %32 : vector<128x1xf32> to vector<128x128xf32>
    %37 = arith.subf %28#1, %36 : vector<128x128xf32>
    %38 = math.exp %37 : vector<128x128xf32>
    %c0_19 = arith.constant 0 : index
    %c0_20 = arith.constant 0 : index
    %39 = vector.load %arg8[%c0_19, %c0_20] : memref<128x1xf32, #tpu.memory_space<vmem>>, vector<128x1xf32>
    %40 = arith.mulf %35, %39 : vector<128x1xf32>
    %cst_21 = arith.constant dense<0.000000e+00> : vector<128xf32>
    %41 = vector.multi_reduction <add>, %38, %cst_21 [1] : vector<128x128xf32> to vector<128xf32>
    %42 = vector.shape_cast %41 : vector<128xf32> to vector<128x1xf32>
    %43 = arith.addf %40, %42 : vector<128x1xf32>
    %c0_22 = arith.constant 0 : index
    %c0_23 = arith.constant 0 : index
    %44 = vector.load %arg8[%c0_22, %c0_23] : memref<128x1xf32, #tpu.memory_space<vmem>>, vector<128x1xf32>
    tpu.vector_store %arg8[%c0_22, %c0_23], %43 {strides = array<i32>} : memref<128x1xf32, #tpu.memory_space<vmem>>, vector<128x1xf32>,
    %c0_24 = arith.constant 0 : index
    %c0_25 = arith.constant 0 : index
    %45 = vector.load %arg7[%c0_24, %c0_25] : memref<128x1xf32, #tpu.memory_space<vmem>>, vector<128x1xf32>
    tpu.vector_store %arg7[%c0_24, %c0_25], %32 {strides = array<i32>} : memref<128x1xf32, #tpu.memory_space<vmem>>, vector<128x1xf32>,
    %c0_26 = arith.constant 0 : index
    %c0_27 = arith.constant 0 : index
    %46 = vector.load %arg9[%c0_26, %c0_27] : memref<128x1xf32, #tpu.memory_space<vmem>>, vector<128x1xf32>
    %47 = arith.mulf %28#2, %10 : vector<128x128xf32>
    %cst_28 = arith.constant dense<0.000000e+00> : vector<128xf32>
    %48 = vector.multi_reduction <add>, %47, %cst_28 [1] : vector<128x128xf32> to vector<128xf32>
    %49 = vector.shape_cast %48 : vector<128xf32> to vector<128x1xf32>
    %50 = arith.addf %46, %49 : vector<128x1xf32>
    %c0_29 = arith.constant 0 : index
    %c0_30 = arith.constant 0 : index
    %51 = vector.load %arg9[%c0_29, %c0_30] : memref<128x1xf32, #tpu.memory_space<vmem>>, vector<128x1xf32>
    tpu.vector_store %arg9[%c0_29, %c0_30], %50 {strides = array<i32>} : memref<128x1xf32, #tpu.memory_space<vmem>>, vector<128x1xf32>,
    %c0_31 = arith.constant 0 : index
    %c0_32 = arith.constant 0 : index
    %52 = vector.load %arg10[%c0_31, %c0_32] : memref<128x1xf32, #tpu.memory_space<vmem>>, vector<128x1xf32>
    %cst_33 = arith.constant dense<0.000000e+00> : vector<128xf32>
    %53 = vector.multi_reduction <add>, %28#2, %cst_33 [1] : vector<128x128xf32> to vector<128xf32>
    %54 = vector.shape_cast %53 : vector<128xf32> to vector<128x1xf32>
    %55 = arith.addf %52, %54 : vector<128x1xf32>
    %c0_34 = arith.constant 0 : index
    %c0_35 = arith.constant 0 : index
    %56 = vector.load %arg10[%c0_34, %c0_35] : memref<128x1xf32, #tpu.memory_space<vmem>>, vector<128x1xf32>
    tpu.vector_store %arg10[%c0_34, %c0_35], %55 {strides = array<i32>} : memref<128x1xf32, #tpu.memory_space<vmem>>, vector<128x1xf32>,
    %c0_i32_36 = arith.constant 0 : i32
    %57 = arith.cmpi eq, %arg1, %c0_i32_36 : i32
    %58 = arith.extui %57 : i1 to i32
    %c0_i32_37 = arith.constant 0 : i32
    %59 = arith.cmpi ne, %58, %c0_i32_37 : i32
    scf.if %59 {
      %c0_38 = arith.constant 0 : index
      %c0_39 = arith.constant 0 : index
      %60 = vector.load %arg7[%c0_38, %c0_39] : memref<128x1xf32, #tpu.memory_space<vmem>>, vector<128x1xf32>
      %c0_40 = arith.constant 0 : index
      %c0_41 = arith.constant 0 : index
      %61 = vector.load %arg8[%c0_40, %c0_41] : memref<128x1xf32, #tpu.memory_space<vmem>>, vector<128x1xf32>
      %62 = math.log %61 : vector<128x1xf32>
      %63 = arith.addf %60, %62 : vector<128x1xf32>
      %c0_42 = arith.constant 0 : index
      %c0_43 = arith.constant 0 : index
      %64 = vector.load %arg10[%c0_42, %c0_43] : memref<128x1xf32, #tpu.memory_space<vmem>>, vector<128x1xf32>
      %c0_44 = arith.constant 0 : index
      %c0_45 = arith.constant 0 : index
      %65 = vector.load %arg9[%c0_44, %c0_45] : memref<128x1xf32, #tpu.memory_space<vmem>>, vector<128x1xf32>
      %66 = arith.mulf %63, %64 : vector<128x1xf32>
      %67 = arith.subf %65, %66 : vector<128x1xf32>
      %68 = arith.divf %67, %64 : vector<128x1xf32>
      %69 = tpu.iota {dimensions = array<i32: 0>} : vector<128x1xi32>
      %70 = vector.broadcast %16 : i32 to vector<128x1xi32>
      %71 = arith.addi %70, %69 : vector<128x1xi32>
      %c16_i32_46 = arith.constant 16 : i32
      %72 = vector.broadcast %c16_i32_46 : i32 to vector<128x1xi32>
      %73 = arith.cmpi slt, %71, %72 : vector<128x1xi32>
      %cst_47 = arith.constant -1.000000e+00 : f32
      %74 = vector.broadcast %cst_47 : f32 to vector<128x1xf32>
      %75 = arith.mulf %74, %68 : vector<128x1xf32>
      %cst_48 = arith.constant 0.000000e+00 : f32
      %76 = vector.broadcast %cst_48 : f32 to vector<128x1xf32>
      %77 = arith.select %73, %75, %76 : vector<128x1xi1>, vector<128x1xf32>
      %c0_49 = arith.constant 0 : index
      %c0_50 = arith.constant 0 : index
      %78 = vector.load %arg6[%c0_49, %c0_50] : memref<128x1xf32, #tpu.memory_space<vmem>>, vector<128x1xf32>
      tpu.vector_store %arg6[%c0_49, %c0_50], %77 {strides = array<i32>} : memref<128x1xf32, #tpu.memory_space<vmem>>, vector<128x1xf32>,
    } else {
    }
    return
  }
  func.func @transform_0(%arg0: i32, %arg1: i32) -> (i32, i32) {
    %c0_i32 = arith.constant 0 : i32
    %c0_i32_0 = arith.constant 0 : i32
    return %arg0, %c0_i32 : i32, i32
  }
  func.func @transform_1(%arg0: i32, %arg1: i32) -> (i32, i32) {
    %c0_i32 = arith.constant 0 : i32
    %c0_i32_0 = arith.constant 0 : i32
    %c0_i32_1 = arith.constant 0 : i32
    return %c0_i32, %c0_i32_0 : i32, i32
  }
  func.func @transform_2(%arg0: i32, %arg1: i32) -> (i32, i32) {
    %c0_i32 = arith.constant 0 : i32
    %c0_i32_0 = arith.constant 0 : i32
    return %arg0, %c0_i32 : i32, i32
  }
  func.func @transform_3(%arg0: i32, %arg1: i32) -> (i32, i32) {
    %c0_i32 = arith.constant 0 : i32
    %c0_i32_0 = arith.constant 0 : i32
    return %c0_i32, %arg1 : i32, i32
  }
  func.func @transform_4(%arg0: i32, %arg1: i32) -> (i32, i32) {
    %c0_i32 = arith.constant 0 : i32
    %c0_i32_0 = arith.constant 0 : i32
    return %arg0, %c0_i32 : i32, i32
  }
}

</mosaic_0001>

<bundles_post_ra>
// kernel: tpu_custom_call.1
= control target key start
LH: loop header
LB: loop body
LE: loop exit
PB: predicated region body
PF: predicated region fallthrough
CT: control target
= control target key end

     0   :  { %v1895_v0 = vmov 0   ;;  %v378_v33 = vlaneseq  ;;  %v2928_v45 = vmov 0.0   ;;  %v2945_v47 = vmov 0  ;;  %s2917_s2 = inlined_call_operand.vmem [shape: s32[128,1], index: 2, kind: input, shape index: {}]   ;;  %s2918_s1 = inlined_call_operand.vmem [shape: bf16[128,128], index: 1, kind: input, shape index: {}]   ;;  %s2919_s3 = inlined_call_operand.vmem [shape: s32[1,128], index: 3, kind: input, shape index: {}]   ;;  %s2920_s0 = inlined_call_operand.vmem [shape: bf16[128,128], index: 0, kind: input, shape index: {}]   ;;  %s2921_s4 = inlined_call_operand.vmem [shape: f32[128,1], index: 4, kind: output, shape index: {}]  }
   0x1   :  { %1819 = vset.pattern.permute.xlu0 %v1895_v0  ;;  %v284_v1 = vld [vmem:[%s2917_s2] sm:$0xff]  ;;  %v1783_v2 = vld [vmem:[%s2918_s1 + $0x38] sm:$0xff]  ;;  %1820 = vset.pattern.permute.xlu1 %v1895_v0  ;;  %v286_v3 = vld [vmem:[%s2917_s2 + $0x10] sm:$0xff]  ;;  %v2953_v61 = vmov 0 }
   0x2   :  { %302 = vperm.xlu0 %1819, %v284_v1   ;;  %308 = vperm.xlu1 %1820, %v286_v3   ;;  %v288_v4 = vld [vmem:[%s2917_s2 + $0x20] sm:$0xff]  ;;  %v285_v5 = vld [vmem:[%s2917_s2 + $0x8] sm:$0xff]  ;;  %v1782_v6 = vld [vmem:[%s2918_s1 + $0x30] sm:$0xff]  ;;  %v2019_v34 = vshrl.u32 %v378_v33, 7  ;;  %v2021_v35 = vand.u32 127, %v378_v33 }
   0x3   :  { %219 = vmatpush.bf16.xpose.msra.mxu0 %v1783_v2  ;;  %1792 = vmatpush.bf16.xpose.msra.mxu1 %v1783_v2  ;;  %v287_v7 = vld [vmem:[%s2917_s2 + $0x18] sm:$0xff]  ;;  %v289_v8 = vld [vmem:[%s2917_s2 + $0x28] sm:$0xff]  ;;  %v290_v9 = vld [vmem:[%s2917_s2 + $0x30] sm:$0xff] }
   0x4   :  { %1793 = vmatpush.bf16.xpose.msra.mxu2 %v1783_v2  ;;  %1794 = vmatpush.bf16.xpose.msra.mxu3 %v1783_v2  ;;  %v1781_v10 = vld [vmem:[%s2918_s1 + $0x28] sm:$0xff]  ;;  %v291_v11 = vld [vmem:[%s2917_s2 + $0x38] sm:$0xff]  ;;  %v292_v12 = vld [vmem:[%s2917_s2 + $0x40] sm:$0xff]  ;;  %vm417_vm0 = vcmp.ne.s32.totalorder %v2019_v34, %v2021_v35  ;;  %v381_v37 = vadd.s32 16, %v2019_v34  ;;  %vm2922_vm1 = vcmp.lt.s32.totalorder %v2021_v35, 16  ;;  %v380_v42 = vadd.s32 8, %v2019_v34 }
   0x5   :  { %1821 = vset.pattern.permute.xlu2 %v1895_v0  ;;  %v293_v13 = vld [vmem:[%s2917_s2 + $0x48] sm:$0xff]  ;;  %v1780_v14 = vld [vmem:[%s2918_s1 + $0x20] sm:$0xff]  ;;  %v294_v15 = vld [vmem:[%s2917_s2 + $0x50] sm:$0xff]  ;;  %v383_v43 = vadd.s32 32, %v2019_v34  ;;  %v384_v44 = vadd.s32 40, %v2019_v34  ;;  %v382_v48 = vadd.s32 24, %v2019_v34 }
   0x6   :  { %314 = vperm.xlu2 %1821, %v288_v4   ;;  %v296_v16 = vld [vmem:[%s2917_s2 + $0x60] sm:$0xff]  ;;  %v1779_v17 = vld [vmem:[%s2918_s1 + $0x18] sm:$0xff]  ;;  %v297_v18 = vld [vmem:[%s2917_s2 + $0x68] sm:$0xff]  ;;  %vm419_vm3 = vcmp.ne.s32.totalorder %v381_v37, %v2021_v35  ;;  %vm418_vm10 = vcmp.ne.s32.totalorder %v380_v42, %v2021_v35  ;;  %v2067_v50 = vadd.s32 120, %v2019_v34  ;;  %v386_v58 = vadd.s32 56, %v2019_v34 }
   0x7   :  { %v295_v19 = vld [vmem:[%s2917_s2 + $0x58] sm:$0xff]  ;;  %v1778_v21 = vld [vmem:[%s2918_s1 + $0x10] sm:$0xff]  ;;  %v1777_v23 = vld [vmem:[%s2918_s1 + $0x8] sm:$0xff]  ;;  %vm421_vm7 = vcmp.ne.s32.totalorder %v383_v43, %v2021_v35  ;;  %vm422_vm14 = vcmp.ne.s32.totalorder %v384_v44, %v2021_v35  ;;  %v385_v59 = vadd.s32 48, %v2019_v34  ;;  %v387_v62 = vadd.s32 64, %v2019_v34 }
   0x8   :  { %v299_v20 = vld [vmem:[%s2917_s2 + $0x78] sm:$0xff]  ;;  %v298_v22 = vld [vmem:[%s2917_s2 + $0x70] sm:$0xff]  ;;  %v1776_v24 = vld [vmem:[%s2918_s1] sm:$0xff]  ;;  %v2116_v63 = vadd.s32 112, %v2019_v34  ;;  %v392_v0 = vadd.s32 104, %v2019_v34  ;;  %v2955_v4 = vmov 0 }
   0x9   :  { %v1784_v25 = vld [vmem:[%s2920_s0] sm:$0xff]  ;;  %v1786_v26 = vld [vmem:[%s2920_s0 + $0x10] sm:$0xff]  ;;  %v1785_v29 = vld [vmem:[%s2920_s0 + $0x8] sm:$0xff]  ;;  %vm425_vm15 = vcmp.ne.s32.totalorder %v387_v62, %v2021_v35 }
   0xa   :  { %305 = vperm.xlu0 %1819, %v285_v5   ;;  %311 = vperm.xlu1 %1820, %v287_v7   ;;  %v1788_v27 = vld [vmem:[%s2920_s0 + $0x20] sm:$0xff]  ;;  %v1790_v28 = vld [vmem:[%s2920_s0 + $0x30] sm:$0xff]  ;;  %v1787_v30 = vld [vmem:[%s2920_s0 + $0x18] sm:$0xff] }
   0xb   :  { %220 = vmatpush.bf16.xpose.msra.mxu0 %v1782_v6  ;;  %1795 = vmatpush.bf16.xpose.msra.mxu1 %v1782_v6  ;;  %v1789_v31 = vld [vmem:[%s2920_s0 + $0x28] sm:$0xff]  ;;  %v1791_v32 = vld [vmem:[%s2920_s0 + $0x38] sm:$0xff]  ;;  %v2030_v38 = vld [vmem:[%s2919_s3] ss:$0 sm:$0xff] }
   0xc   :  { %1796 = vmatpush.bf16.xpose.msra.mxu2 %v1782_v6  ;;  %1797 = vmatpush.bf16.xpose.msra.mxu3 %v1782_v6  ;;  %vm2034_vm2 = vmand %vm2922_vm1, %vm417_vm0  ;;  %v2957_v6 = vmov 0 }
   0xd   :  { %vm2053_vm9 = vmand %vm2922_vm1, %vm419_vm3  ;;  %vm420_vm3 = vcmp.ne.s32.totalorder %v382_v48, %v2021_v35 }
   0xe   :  { %317 = vperm.xlu2 %1821, %v289_v8   ;;  %v2946_v47 = vsel %vm2053_vm9, 4294967295, %v2945_v47  ;;  %vm2062_vm11 = vmand %vm2922_vm1, %vm421_vm7  ;;  %v389_v8 = vadd.s32 80, %v2019_v34 }
   0xf   :  { %vm2081_vm0 = vmand %vm2922_vm1, %vm418_vm10 }
  0x10   :  { %vm2108_vm10 = vmand %vm2922_vm1, %vm420_vm3  ;;  %vm423_vm3 = vcmp.ne.s32.totalorder %v385_v59, %v2021_v35 }
  0x11   :  { %v2954_v61 = vsel %vm2108_vm10, 4294967295, %v2953_v61 }
  0x12   :  { %320 = vperm.xlu0 %1819, %v290_v9   ;;  %323 = vperm.xlu1 %1820, %v291_v11   ;;  %v388_v9 = vadd.s32 72, %v2019_v34  ;;  %v390_v11 = vadd.s32 88, %v2019_v34 }
  0x13   :  { %221 = vmatpush.bf16.xpose.msra.mxu0 %v1781_v10  ;;  %1798 = vmatpush.bf16.xpose.msra.mxu1 %v1781_v10 }
  0x14   :  { %1799 = vmatpush.bf16.xpose.msra.mxu2 %v1781_v10  ;;  %1800 = vmatpush.bf16.xpose.msra.mxu3 %v1781_v10 }
  0x16   :  { %326 = vperm.xlu2 %1821, %v292_v12  }
  0x1a   :  { %329 = vperm.xlu0 %1819, %v293_v13   ;;  %332 = vperm.xlu1 %1820, %v294_v15   ;;  %v2962_v15 = vmov 0 }
  0x1b   :  { %222 = vmatpush.bf16.xpose.msra.mxu0 %v1780_v14  ;;  %1801 = vmatpush.bf16.xpose.msra.mxu1 %v1780_v14 }
  0x1c   :  { %1802 = vmatpush.bf16.xpose.msra.mxu2 %v1780_v14  ;;  %1803 = vmatpush.bf16.xpose.msra.mxu3 %v1780_v14 }
  0x1e   :  { %335 = vperm.xlu2 %1821, %v295_v19  }
  0x22   :  { %338 = vperm.xlu0 %1819, %v296_v16   ;;  %341 = vperm.xlu1 %1820, %v297_v18  }
  0x23   :  { %223 = vmatpush.bf16.xpose.msra.mxu0 %v1779_v17  ;;  %1804 = vmatpush.bf16.xpose.msra.mxu1 %v1779_v17 }
  0x24   :  { %1805 = vmatpush.bf16.xpose.msra.mxu2 %v1779_v17  ;;  %1806 = vmatpush.bf16.xpose.msra.mxu3 %v1779_v17 }
  0x26   :  { %344 = vperm.xlu2 %1821, %v298_v22  }
  0x2a   :  { %347 = vperm.xlu0 %1819, %v299_v20  }
  0x2b   :  { %224 = vmatpush.bf16.xpose.msra.mxu0 %v1778_v21  ;;  %1807 = vmatpush.bf16.xpose.msra.mxu1 %v1778_v21 }
  0x2c   :  { %1808 = vmatpush.bf16.xpose.msra.mxu2 %v1778_v21  ;;  %1809 = vmatpush.bf16.xpose.msra.mxu3 %v1778_v21  ;;  %v391_v21 = vadd.s32 96, %v2019_v34 }
  0x33   :  { %225 = vmatpush.bf16.xpose.msra.mxu0 %v1777_v23  ;;  %1810 = vmatpush.bf16.xpose.msra.mxu1 %v1777_v23 }
  0x34   :  { %1811 = vmatpush.bf16.xpose.msra.mxu2 %v1777_v23  ;;  %1812 = vmatpush.bf16.xpose.msra.mxu3 %v1777_v23 }
  0x3b   :  { %226 = vmatpush.bf16.xpose.msra.mxu0 %v1776_v24  ;;  %1813 = vmatpush.bf16.xpose.msra.mxu1 %v1776_v24 }
  0x3c   :  { %1814 = vmatpush.bf16.xpose.msra.mxu2 %v1776_v24  ;;  %1815 = vmatpush.bf16.xpose.msra.mxu3 %v1776_v24 }
  0x42   :  { %227 = vmatmul.bf16.vlgmr.msra.gmra.mxu0 %v1784_v25  ;;  %237 = vmatmul.bf16.vlgmr.msra.gmra.mxu1 %v1786_v26 }
  0x43   :  { %247 = vmatmul.bf16.vlgmr.msra.gmra.mxu2 %v1788_v27  ;;  %257 = vmatmul.bf16.vlgmr.msra.gmra.mxu3 %v1790_v28 }
  0x52   :  { %232 = vmatmul.bf16.gmra.mxu0 %v1785_v29  ;;  %242 = vmatmul.bf16.gmra.mxu1 %v1787_v30 }
  0x53   :  { %252 = vmatmul.bf16.gmra.mxu2 %v1789_v31  ;;  %262 = vmatmul.bf16.gmra.mxu3 %v1791_v32 }
  0x60   :  { %v315_v36 = vpop.permute.xlu2 %314 }
  0x61   :  { %vm354_vm5 = vcmp.eq.s32.totalorder %v315_v36, %v2030_v38 }
  0x62   :  { %vm485_vm12 = vmand %vm354_vm5, %vm2062_vm11 }
  0x63   :  { %v2074_v52 = vsel %vm485_vm12, 1.0, %v2928_v45  ;;  %vm2093_vm5 = vmand %vm2922_vm1, %vm422_vm14 }
  0x64   :  { %1133 = vadd.xlane.f32.xlu0 %v2074_v52 }
  0x68   :  { %v318_v51 = vpop.permute.xlu2 %317 }
  0x69   :  { %vm355_vm7 = vcmp.eq.s32.totalorder %v318_v51, %v2030_v38 }
  0x6a   :  { %vm486_vm12 = vmand %vm355_vm7, %vm2093_vm5 }
  0x6b   :  { %v2146_v7 = vsel %vm486_vm12, 1.0, %v2928_v45  ;;  %vm427_vm12 = vcmp.ne.s32.totalorder %v389_v8, %v2021_v35 }
  0x70   :  { %v327_v1 = vpop.permute.xlu2 %326 }
  0x74   :  { %v303_v40 = vpop.permute.xlu0 %302  ;;  %v309_v41 = vpop.permute.xlu1 %308 }
  0x75   :  { %vm350_vm4 = vcmp.eq.s32.totalorder %v303_v40, %v2030_v38  ;;  %vm352_vm8 = vcmp.eq.s32.totalorder %v309_v41, %v2030_v38 }
  0x76   :  { %vm481_vm6 = vmand %vm350_vm4, %vm2034_vm2 }
  0x77   :  { %v2049_v46 = vsel %vm481_vm6, 1.0, %v2928_v45  ;;  %vm483_vm13 = vmand %vm352_vm8, %vm2053_vm9 }
  0x78   :  { %1125 = vadd.xlane.f32.xlu2 %v2049_v46  ;;  %v2089_v56 = vsel %vm483_vm13, 1.0, %v2928_v45  ;;  %vm424_vm13 = vcmp.ne.s32.totalorder %v386_v58, %v2021_v35  ;;  %v336_v18 = vpop.permute.xlu2 %335 }
  0x79   :  { %vm2131_vm7 = vmand %vm2922_vm1, %vm424_vm13  ;;  %vm358_vm13 = vcmp.eq.s32.totalorder %v327_v1, %v2030_v38 }
  0x7a   :  { %v2956_v4 = vsel %vm2131_vm7, 4294967295, %v2955_v4 }
  0x7c   :  { %v306_v54 = vpop.permute.xlu0 %305  ;;  %v312_v55 = vpop.permute.xlu1 %311 }
  0x7d   :  { %vm351_vm4 = vcmp.eq.s32.totalorder %v306_v54, %v2030_v38  ;;  %vm353_vm8 = vcmp.eq.s32.totalorder %v312_v55, %v2030_v38 }
  0x7e   :  { %vm482_vm6 = vmand %vm351_vm4, %vm2081_vm0 }
  0x7f   :  { %v2103_v60 = vsel %vm482_vm6, 1.0, %v2928_v45  ;;  %vm484_vm14 = vmand %vm353_vm8, %vm2108_vm10  ;;  %vm428_vm10 = vcmp.ne.s32.totalorder %v390_v11, %v2021_v35 }
  0x80   :  { %1127 = vadd.xlane.f32.xlu1 %v2103_v60  ;;  %1129 = vadd.xlane.f32.xlu2 %v2089_v56  ;;  %v2136_v5 = vsel %vm484_vm14, 1.0, %v2928_v45  ;;  %vm2140_vm8 = vmand %vm2922_vm1, %vm423_vm3 }
  0x81   :  { %v2958_v6 = vsel %vm2140_vm8, 4294967295, %v2957_v6  ;;  %vm2153_vm14 = vmand %vm2922_vm1, %vm425_vm15 }
  0x82   :  { %vm489_vm15 = vmand %vm358_vm13, %vm2153_vm14 }
  0x83   :  { %v1752_v19 = vsel %vm489_vm15, 1.0, %v2928_v45 }
  0x84   :  { %v321_v2 = vpop.permute.xlu0 %320  ;;  %v324_v3 = vpop.permute.xlu1 %323 }
  0x85   :  { %vm357_vm4 = vcmp.eq.s32.totalorder %v324_v3, %v2030_v38  ;;  %vm356_vm3 = vcmp.eq.s32.totalorder %v321_v2, %v2030_v38 }
  0x86   :  { %vm488_vm6 = vmand %vm357_vm4, %vm2131_vm7  ;;  %vm426_vm4 = vcmp.ne.s32.totalorder %v388_v9, %v2021_v35  ;;  %vm2961_vm7 = vcmp.lt.s32.totalorder %v2021_v35, 16 }
  0x87   :  { %v2164_v12 = vsel %vm488_vm6, 1.0, %v2928_v45  ;;  %vm487_vm1 = vmand %vm356_vm3, %vm2140_vm8  ;;  %vm361_vm8 = vcmp.eq.s32.totalorder %v336_v18, %v2030_v38  ;;  %v345_v18 = vpop.permute.xlu2 %344 }
  0x88   :  { %1131 = vadd.xlane.f32.xlu1 %v2136_v5  ;;  %1135 = vadd.xlane.f32.xlu2 %v2146_v7  ;;  %vm2176_vm6 = vmand %vm2961_vm7, %vm427_vm12  ;;  %v2181_v16 = vsel %vm487_vm1, 1.0, %v2928_v45 }
  0x89   :  { %1139 = vadd.xlane.f32.xlu0 %v2164_v12  ;;  %v2963_v15 = vsel %vm2176_vm6, 4294967295, %v2962_v15  ;;  %vm2964_vm13 = vmmov %vm2961_vm7 }
  0x8a   :  { %vm2185_vm9 = vmand %vm2964_vm13, %vm426_vm4  ;;  %vm429_vm13 = vcmp.ne.s32.totalorder %v391_v21, %v2021_v35 }
  0x8b   :  { %vm2194_vm12 = vmand %vm2961_vm7, %vm428_vm10  ;;  %vm2969_vm7 = vcmp.ne.s32.totalorder %v392_v0, %v2021_v35 }
  0x8c   :  { %v330_v13 = vpop.permute.xlu0 %329  ;;  %v333_v14 = vpop.permute.xlu1 %332  ;;  %vm492_vm10 = vmand %vm361_vm8, %vm2194_vm12 }
  0x8d   :  { %vm360_vm3 = vcmp.eq.s32.totalorder %v333_v14, %v2030_v38  ;;  %vm359_vm1 = vcmp.eq.s32.totalorder %v330_v13, %v2030_v38  ;;  %v2225_v26 = vsel %vm492_vm10, 1.0, %v2928_v45 }
  0x8e   :  { %vm491_vm4 = vmand %vm360_vm3, %vm2176_vm6  ;;  %vm2970_vm3 = vcmp.lt.s32.totalorder %v2021_v35, 16 }
  0x8f   :  { %v2204_v22 = vsel %vm491_vm4, 1.0, %v2928_v45  ;;  %vm490_vm15 = vmand %vm359_vm1, %vm2185_vm9 }
  0x90   :  { %1137 = vadd.xlane.f32.xlu1 %v2181_v16  ;;  %1141 = vadd.xlane.f32.xlu2 %v1752_v19  ;;  %vm2216_vm6 = vmand %vm2970_vm3, %vm2969_vm7  ;;  %v2221_v25 = vsel %vm490_vm15, 1.0, %v2928_v45 }
  0x91   :  { %1145 = vadd.xlane.f32.xlu0 %v2204_v22  ;;  %vm2973_vm8 = vmmov %vm2970_vm3 }
  0x92   :  { %vm2229_vm1 = vmand %vm2973_vm8, %vm429_vm13 }
  0x93   :  { %vm2978_vm15 = vmmov %vm2973_vm8 }
  0x94   :  { %v342_v24 = vpop.permute.xlu1 %341  ;;  %v339_v27 = vpop.permute.xlu0 %338  ;;  %vm2979_vm13 = vmmov %vm2973_vm8 }
  0x95   :  { %vm363_vm4 = vcmp.eq.s32.totalorder %v342_v24, %v2030_v38  ;;  %vm362_vm7 = vcmp.eq.s32.totalorder %v339_v27, %v2030_v38 }
  0x96   :  { %vm2236_vm3 = vmand %vm363_vm4, %vm2216_vm6 }
  0x97   :  { %vm493_vm10 = vmand %vm362_vm7, %vm2229_vm1  ;;  %v2322_v14 = vsel %vm2236_vm3, 1.0, %v2928_v45 }
  0x98   :  { %1143 = vadd.xlane.f32.xlu1 %v2221_v25  ;;  %1147 = vadd.xlane.f32.xlu2 %v2225_v26  ;;  %v1756_v30 = vsel %vm493_vm10, 1.0, %v2928_v45  ;;  %vm2980_vm4 = vmmov %vm2973_vm8  ;;  %vm21_vm10 = vcmask 7168  }
  0x99   :  { %vm2981_vm8 = vmmov %vm2980_vm4  ;;  %71 = vst.msk [vmem:[#allocation5 + $0x8] sm:$0xff] %vm21_vm10, %v2928_v45 }
  0x9a   :  { %vm2982_vm7 = vmmov %vm2980_vm4  ;;  %38 = vst.msk [vmem:[#allocation3] sm:$0xff] %vm21_vm10, %v2928_v45 }
  0x9b   :  { %39 = vst.msk [vmem:[#allocation3 + $0x8] sm:$0xff] %vm21_vm10, %v2928_v45  ;;  %vm2985_vm3 = vmmov %vm2980_vm4 }
  0x9c   :  { %40 = vst.msk [vmem:[#allocation3 + $0x10] sm:$0xff] %vm21_vm10, %v2928_v45 }
  0x9d   :  { %41 = vst.msk [vmem:[#allocation3 + $0x18] sm:$0xff] %vm21_vm10, %v2928_v45 }
  0x9e   :  { %42 = vst.msk [vmem:[#allocation3 + $0x20] sm:$0xff] %vm21_vm10, %v2928_v45 }
  0x9f   :  { %43 = vst.msk [vmem:[#allocation3 + $0x28] sm:$0xff] %vm21_vm10, %v2928_v45 }
  0xa0   :  { %1149 = vadd.xlane.f32.xlu1 %v1756_v30  ;;  %44 = vst.msk [vmem:[#allocation3 + $0x30] sm:$0xff] %vm21_vm10, %v2928_v45 }
  0xa1   :  { %45 = vst.msk [vmem:[#allocation3 + $0x38] sm:$0xff] %vm21_vm10, %v2928_v45 }
  0xa2   :  { %46 = vst.msk [vmem:[#allocation3 + $0x40] sm:$0xff] %vm21_vm10, %v2928_v45 }
  0xa3   :  { %47 = vst.msk [vmem:[#allocation3 + $0x48] sm:$0xff] %vm21_vm10, %v2928_v45 }
  0xa4   :  { %48 = vst.msk [vmem:[#allocation3 + $0x50] sm:$0xff] %vm21_vm10, %v2928_v45 }
  0xa5   :  { %49 = vst.msk [vmem:[#allocation3 + $0x58] sm:$0xff] %vm21_vm10, %v2928_v45 }
  0xa6   :  { %50 = vst.msk [vmem:[#allocation3 + $0x60] sm:$0xff] %vm21_vm10, %v2928_v45 }
  0xa7   :  { %51 = vst.msk [vmem:[#allocation3 + $0x68] sm:$0xff] %vm21_vm10, %v2928_v45 }
  0xa8   :  { %52 = vst.msk [vmem:[#allocation3 + $0x70] sm:$0xff] %vm21_vm10, %v2928_v45 }
  0xa9   :  { %53 = vst.msk [vmem:[#allocation3 + $0x78] sm:$0xff] %vm21_vm10, %v2928_v45 }
  0xaa   :  { %54 = vst.msk [vmem:[#allocation4] sm:$0xff] %vm21_vm10, %v2928_v45 }
  0xab   :  { %55 = vst.msk [vmem:[#allocation4 + $0x8] sm:$0xff] %vm21_vm10, %v2928_v45 }
  0xac   :  { %56 = vst.msk [vmem:[#allocation4 + $0x10] sm:$0xff] %vm21_vm10, %v2928_v45 }
  0xad   :  { %57 = vst.msk [vmem:[#allocation4 + $0x18] sm:$0xff] %vm21_vm10, %v2928_v45 }
  0xae   :  { %58 = vst.msk [vmem:[#allocation4 + $0x20] sm:$0xff] %vm21_vm10, %v2928_v45 }
  0xaf   :  { %59 = vst.msk [vmem:[#allocation4 + $0x28] sm:$0xff] %vm21_vm10, %v2928_v45 }
  0xb0   :  { %60 = vst.msk [vmem:[#allocation4 + $0x30] sm:$0xff] %vm21_vm10, %v2928_v45 }
  0xb1   :  { %61 = vst.msk [vmem:[#allocation4 + $0x38] sm:$0xff] %vm21_vm10, %v2928_v45 }
  0xb2   :  { %62 = vst.msk [vmem:[#allocation4 + $0x40] sm:$0xff] %vm21_vm10, %v2928_v45 }
  0xb3   :  { %63 = vst.msk [vmem:[#allocation4 + $0x48] sm:$0xff] %vm21_vm10, %v2928_v45 }
  0xb4   :  { %64 = vst.msk [vmem:[#allocation4 + $0x50] sm:$0xff] %vm21_vm10, %v2928_v45 }
  0xb5   :  { %65 = vst.msk [vmem:[#allocation4 + $0x58] sm:$0xff] %vm21_vm10, %v2928_v45 }
  0xb6   :  { %66 = vst.msk [vmem:[#allocation4 + $0x60] sm:$0xff] %vm21_vm10, %v2928_v45 }
  0xb7   :  { %67 = vst.msk [vmem:[#allocation4 + $0x68] sm:$0xff] %vm21_vm10, %v2928_v45 }
  0xb8   :  { %68 = vst.msk [vmem:[#allocation4 + $0x70] sm:$0xff] %vm21_vm10, %v2928_v45 }
  0xb9   :  { %69 = vst.msk [vmem:[#allocation4 + $0x78] sm:$0xff] %vm21_vm10, %v2928_v45 }
  0xba   :  { %70 = vst.msk [vmem:[#allocation5] sm:$0xff] %vm21_vm10, %v2928_v45 }
  0xbb   :  { %72 = vst.msk [vmem:[#allocation5 + $0x10] sm:$0xff] %vm21_vm10, %v2928_v45 }
  0xbc   :  { %73 = vst.msk [vmem:[#allocation5 + $0x18] sm:$0xff] %vm21_vm10, %v2928_v45 }
  0xbd   :  { %74 = vst.msk [vmem:[#allocation5 + $0x20] sm:$0xff] %vm21_vm10, %v2928_v45 }
  0xbe   :  { %75 = vst.msk [vmem:[#allocation5 + $0x28] sm:$0xff] %vm21_vm10, %v2928_v45 }
  0xbf   :  { %v228_v31 = vpop.f32.mrf.mxu0  ;;  %v238_v36 = vpop.f32.mrf.mxu1  ;;  %76 = vst.msk [vmem:[#allocation5 + $0x30] sm:$0xff] %vm21_vm10, %v2928_v45 }
  0xc0   :  { %v2245_v32 = vmul.f32 20.0, %v228_v31  ;;  %v2252_v37 = vmul.f32 20.0, %v238_v36  ;;  %77 = vst.msk [vmem:[#allocation5 + $0x38] sm:$0xff] %vm21_vm10, %v2928_v45 }
  0xc1   :  { %78 = vst.msk [vmem:[#allocation5 + $0x40] sm:$0xff] %vm21_vm10, %v2928_v45 }
  0xc2   :  { %v449_v33 = vsel %vm2978_vm15, %v2245_v32, -1e+30  ;;  %v1029_v34 = vmul.f32 %v2049_v46, %v2245_v32  ;;  %v453_v44 = vsel %vm2979_vm13, %v2252_v37, -1e+30  ;;  %v1033_v0 = vmul.f32 %v2074_v52, %v2252_v37  ;;  %vm2983_vm15 = vmmov %vm2980_vm4  ;;  %79 = vst.msk [vmem:[#allocation5 + $0x48] sm:$0xff] %vm21_vm10, %v2928_v45 }
  0xc3   :  { %676 = vmax.xlane.f32.xlu1 %v449_v33  ;;  %vm2984_vm13 = vmmov %vm2980_vm4  ;;  %80 = vst.msk [vmem:[#allocation5 + $0x50] sm:$0xff] %vm21_vm10, %v2928_v45  ;;  %v465_v10 = vsel %vm2034_vm2, %v2245_v32, -1e+30  ;;  %vm3016_vm2 = vnez %v2946_v47 }
  0xc4   :  { %1045 = vadd.xlane.f32.xlu2 %v1029_v34  ;;  %v2359_v34 = vpop.permute.xlu0 %347  ;;  %81 = vst.msk [vmem:[#allocation5 + $0x58] sm:$0xff] %vm21_vm10, %v2928_v45 }
  0xc5   :  { %82 = vst.msk [vmem:[#allocation5 + $0x60] sm:$0xff] %vm21_vm10, %v2928_v45 }
  0xc6   :  { %v248_v40 = vpop.f32.mrf.mxu2  ;;  %v258_v41 = vpop.f32.mrf.mxu3  ;;  %83 = vst.msk [vmem:[#allocation5 + $0x68] sm:$0xff] %vm21_vm10, %v2928_v45 }
  0xc7   :  { %v2254_v42 = vmul.f32 20.0, %v248_v40  ;;  %v2256_v43 = vmul.f32 20.0, %v258_v41  ;;  %v230_v51 = vpop.f32.mrf.mxu0  ;;  %v240_v3 = vpop.f32.mrf.mxu1  ;;  %84 = vst.msk [vmem:[#allocation5 + $0x70] sm:$0xff] %vm21_vm10, %v2928_v45 }
  0xc8   :  { %v2270_v58 = vmul.f32 20.0, %v230_v51  ;;  %v2294_v8 = vmul.f32 20.0, %v240_v3  ;;  %v1110_v51 = vld [vmem:[#allocation5 + $0x8] sm:$0xff]  ;;  %85 = vst.msk [vmem:[#allocation5 + $0x78] sm:$0xff] %vm21_vm10, %v2928_v45 }
  0xc9   :  { %v461_v48 = vsel %vm2980_vm4, %v2256_v43, -1e+30  ;;  %v457_v46 = vsel %vm2981_vm8, %v2254_v42, -1e+30  ;;  %v1037_v62 = vmul.f32 %v1752_v19, %v2254_v42  ;;  %v1041_v52 = vmul.f32 %v1756_v30, %v2256_v43  ;;  %vm2986_vm4 = vmmov %vm2985_vm3 }
  0xca   :  { %700 = vmax.xlane.f32.xlu0 %v461_v48  ;;  %v450_v2 = vsel %vm2982_vm7, %v2270_v58, -1e+30  ;;  %v1030_v11 = vmul.f32 %v2103_v60, %v2270_v58  ;;  %v454_v13 = vsel %vm2983_vm15, %v2294_v8, -1e+30  ;;  %v1034_v60 = vmul.f32 %v2146_v7, %v2294_v8  ;;  %vm2988_vm7 = vmmov %vm2985_vm3 }
  0xcb   :  { %684 = vmax.xlane.f32.xlu1 %v453_v44  ;;  %vm2987_vm8 = vcmp.ne.s32.totalorder %v2116_v63, %v2021_v35 }
  0xcc   :  { %692 = vmax.xlane.f32.xlu2 %v457_v46  ;;  %vm2366_vm15 = vmand %vm2988_vm7, %vm2987_vm8 }
  0xcd   :  { %vm2991_vm8 = vmmov %vm2986_vm4 }
  0xce   :  { %v260_v55 = vpop.f32.mrf.mxu3  ;;  %v250_v9 = vpop.f32.mrf.mxu2  ;;  %vm2992_vm7 = vmmov %vm2986_vm4 }
  0xcf   :  { %v2272_v59 = vmul.f32 20.0, %v260_v55  ;;  %v243_v21 = vpop.f32.mrf.mxu1  ;;  %v2337_v27 = vmul.f32 20.0, %v250_v9 }
  0xd0   :  { %v2341_v29 = vmul.f32 20.0, %v243_v21 }
  0xd1   :  { %v462_v19 = vsel %vm2984_vm13, %v2272_v59, -1e+30  ;;  %v1042_v7 = vmul.f32 %v2322_v14, %v2272_v59  ;;  %v458_v33 = vsel %vm2986_vm4, %v2337_v27, -1e+30  ;;  %vm364_vm13 = vcmp.eq.s32.totalorder %v345_v18, %v2030_v38 }
  0xd2   :  { %1061 = vadd.xlane.f32.xlu0 %v1037_v62  ;;  %v1035_v41 = vmul.f32 %v2181_v16, %v2341_v29  ;;  %v1038_v16 = vmul.f32 %v2221_v25, %v2337_v27  ;;  %v233_v62 = vpop.f32.mrf.mxu0 }
  0xd3   :  { %1053 = vadd.xlane.f32.xlu1 %v1033_v0 }
  0xd4   :  { %678 = vmax.xlane.f32.xlu2 %v450_v2 }
  0xd6   :  { %v253_v24 = vpop.f32.mrf.mxu2  ;;  %v263_v40 = vpop.f32.mrf.mxu3 }
  0xd7   :  { %v2343_v30 = vmul.f32 20.0, %v253_v24  ;;  %v2381_v44 = vmul.f32 20.0, %v263_v40  ;;  %v2405_v25 = vpop.xlane.xlu0 %1133  ;;  %v245_v9 = vpop.f32.mrf.mxu1 }
  0xd9   :  { %v459_v31 = vsel %vm2985_vm3, %v2343_v30, -1e+30  ;;  %vm495_vm3 = vmand %vm364_vm13, %vm2366_vm15  ;;  %v463_v55 = vsel %vm2986_vm4, %v2381_v44, -1e+30  ;;  %v1039_v18 = vmul.f32 %v2204_v22, %v2343_v30  ;;  %v1112_v22 = vld [vmem:[#allocation5 + $0x18] sm:$0xff] }
  0xda   :  { %1069 = vadd.xlane.f32.xlu0 %v1041_v52  ;;  %v2392_v48 = vsel %vm495_vm3, 1.0, %v2928_v45  ;;  %v2411_v52 = vmul.f32 20.0, %v233_v62  ;;  %v235_v24 = vpop.f32.mrf.mxu0  ;;  %vm2993_vm13 = vmmov %vm2986_vm4  ;;  %v1115_v62 = vld [vmem:[#allocation5 + $0x30] sm:$0xff]  ;;  %v479_v17 = vsel %vm2366_vm15, %v2381_v44, -1e+30 }
  0xdb   :  { %1047 = vadd.xlane.f32.xlu1 %v1030_v11  ;;  %v1043_v46 = vmul.f32 %v2392_v48, %v2381_v44  ;;  %v2446_v40 = vmul.f32 20.0, %v235_v24  ;;  %vm2994_vm3 = vmmov %vm2986_vm4  ;;  %vm2995_vm4 = vcmp.ne.s32.totalorder %v2067_v50, %v2021_v35 }
  0xdc   :  { %686 = vmax.xlane.f32.xlu2 %v454_v13  ;;  %v451_v11 = vsel %vm2991_vm8, %v2411_v52, -1e+30  ;;  %v2421_v13 = vmul.f32 20.0, %v245_v9  ;;  %vm2996_vm8 = vmmov %vm2994_vm3  ;;  %v467_v23 = vsel %vm3016_vm2, %v2411_v52, -1e+30 }
  0xdd   :  { %v452_v9 = vsel %vm2994_vm3, %v2446_v40, -1e+30 }
  0xe2   :  { %1055 = vadd.xlane.f32.xlu0 %v1034_v60  ;;  %v456_v60 = vsel %vm2992_vm7, %v2421_v13, -1e+30  ;;  %vm2492_vm7 = vmand %vm2996_vm8, %vm2995_vm4 }
  0xe3   :  { %702 = vmax.xlane.f32.xlu1 %v462_v19  ;;  %vm2999_vm4 = vmmov %vm2994_vm3 }
  0xe4   :  { %1071 = vadd.xlane.f32.xlu2 %v1042_v7 }
  0xea   :  { %694 = vmax.xlane.f32.xlu0 %v458_v33  ;;  %v1111_v33 = vld [vmem:[#allocation5 + $0x10] sm:$0xff] }
  0xeb   :  { %696 = vmax.xlane.f32.xlu1 %v459_v31  ;;  %v1126_v63 = vpop.xlane.xlu2 %1125  ;;  %v1109_v31 = vld [vmem:[#allocation5] sm:$0xff] }
  0xec   :  { %1057 = vadd.xlane.f32.xlu2 %v1035_v41  ;;  %v1157_v41 = vadd.f32 %v1126_v63, %v1109_v31  ;;  %v1116_v31 = vld [vmem:[#allocation5 + $0x38] sm:$0xff] }
  0xee   :  { %1173 = vst.msk [vmem:[#allocation5] sm:$0xff] %vm21_vm10, %v1157_v41 }
  0xf2   :  { %1063 = vadd.xlane.f32.xlu0 %v1038_v16  ;;  %v455_v16 = vsel %vm2993_vm13, %v2341_v29, -1e+30  ;;  %vm365_vm13 = vcmp.eq.s32.totalorder %v2359_v34, %v2030_v38 }
  0xf3   :  { %1073 = vadd.xlane.f32.xlu1 %v1043_v46  ;;  %v1128_v0 = vpop.xlane.xlu1 %1127  ;;  %v1130_v2 = vpop.xlane.xlu2 %1129  ;;  %v1036_v46 = vmul.f32 %v2164_v12, %v2421_v13  ;;  %vm496_vm8 = vmand %vm365_vm13, %vm2492_vm7 }
  0xf4   :  { %v1158_v3 = vadd.f32 %v1128_v0, %v1110_v51  ;;  %704 = vmax.xlane.f32.xlu2 %v463_v55  ;;  %v255_v51 = vpop.f32.mrf.mxu2  ;;  %v1114_v0 = vld [vmem:[#allocation5 + $0x28] sm:$0xff]  ;;  %v1159_v63 = vadd.f32 %v1130_v2, %v1111_v33  ;;  %v2513_v34 = vsel %vm496_vm8, 1.0, %v2928_v45 }
  0xf6   :  { %1174 = vst.msk [vmem:[#allocation5 + $0x8] sm:$0xff] %vm21_vm10, %v1158_v3 }
  0xf7   :  { %1175 = vst.msk [vmem:[#allocation5 + $0x10] sm:$0xff] %vm21_vm10, %v1159_v63 }
  0xfa   :  { %680 = vmax.xlane.f32.xlu0 %v451_v11  ;;  %v1113_v11 = vld [vmem:[#allocation5 + $0x20] sm:$0xff] }
  0xfb   :  { %690 = vmax.xlane.f32.xlu1 %v456_v60  ;;  %v1132_v19 = vpop.xlane.xlu1 %1131  ;;  %v1136_v7 = vpop.xlane.xlu2 %1135  ;;  %v1161_v2 = vadd.f32 %v2405_v25, %v1113_v11  ;;  %v1032_v25 = vmul.f32 %v2136_v5, %v2446_v40  ;;  %v1897_v5 = vmov -1e+30  }
  0xfc   :  { %1065 = vadd.xlane.f32.xlu2 %v1039_v18  ;;  %v1140_v21 = vpop.xlane.xlu0 %1139  ;;  %v1160_v55 = vadd.f32 %v1132_v19, %v1112_v22  ;;  %v1117_v18 = vld [vmem:[#allocation5 + $0x40] sm:$0xff]  ;;  %v2464_v19 = vmul.f32 20.0, %v255_v51  ;;  %v1162_v24 = vadd.f32 %v1136_v7, %v1114_v0  ;;  %v1119_v22 = vld [vmem:[#allocation5 + $0x50] sm:$0xff]  ;;  %v1118_v7 = vld [vmem:[#allocation5 + $0x48] sm:$0xff]  ;;  %22 = vst.msk [vmem:[#allocation2] sm:$0xff] %vm21_vm10, %v1897_v5 }
  0xfd   :  { %v1164_v51 = vadd.f32 %v1140_v21, %v1116_v31  ;;  %1177 = vst.msk [vmem:[#allocation5 + $0x20] sm:$0xff] %vm21_vm10, %v1161_v2  ;;  %v265_v21 = vpop.f32.mrf.mxu3 }
  0xfe   :  { %1176 = vst.msk [vmem:[#allocation5 + $0x18] sm:$0xff] %vm21_vm10, %v1160_v55  ;;  %v1040_v41 = vmul.f32 %v2225_v26, %v2464_v19  ;;  %v1120_v55 = vld [vmem:[#allocation5 + $0x58] sm:$0xff]  ;;  %v476_v36 = vsel %vm2194_vm12, %v2464_v19, -1e+30 }
  0xff   :  { %1178 = vst.msk [vmem:[#allocation5 + $0x28] sm:$0xff] %vm21_vm10, %v1162_v24  ;;  %v1013_v24 = vld [vmem:[#allocation4] sm:$0xff] }
 0x100   :  { %1180 = vst.msk [vmem:[#allocation5 + $0x38] sm:$0xff] %vm21_vm10, %v1164_v51 }
 0x101   :  { %23 = vst.msk [vmem:[#allocation2 + $0x8] sm:$0xff] %vm21_vm10, %v1897_v5 }
 0x102   :  { %688 = vmax.xlane.f32.xlu0 %v455_v16  ;;  %24 = vst.msk [vmem:[#allocation2 + $0x10] sm:$0xff] %vm21_vm10, %v1897_v5 }
 0x103   :  { %1059 = vadd.xlane.f32.xlu1 %v1036_v46  ;;  %v1138_v3 = vpop.xlane.xlu1 %1137  ;;  %v1142_v12 = vpop.xlane.xlu2 %1141  ;;  %v1031_v46 = vmul.f32 %v2089_v56, %v2411_v52  ;;  %25 = vst.msk [vmem:[#allocation2 + $0x18] sm:$0xff] %vm21_vm10, %v1897_v5 }
 0x104   :  { %v1163_v60 = vadd.f32 %v1138_v3, %v1115_v62  ;;  %682 = vmax.xlane.f32.xlu2 %v452_v9  ;;  %v1146_v33 = vpop.xlane.xlu0 %1145  ;;  %v1165_v16 = vadd.f32 %v1142_v12, %v1117_v18  ;;  %v2483_v3 = vmul.f32 20.0, %v265_v21  ;;  %v1121_v12 = vld [vmem:[#allocation5 + $0x60] sm:$0xff]  ;;  %26 = vst.msk [vmem:[#allocation2 + $0x20] sm:$0xff] %vm21_vm10, %v1897_v5 }
 0x105   :  { %v1167_v62 = vadd.f32 %v1146_v33, %v1119_v22  ;;  %27 = vst.msk [vmem:[#allocation2 + $0x28] sm:$0xff] %vm21_vm10, %v1897_v5  ;;  %v2527_v18 = vld [vmem:[#allocation2] sm:$0xff] }
 0x106   :  { %1179 = vst.msk [vmem:[#allocation5 + $0x30] sm:$0xff] %vm21_vm10, %v1163_v60  ;;  %v464_v11 = vsel %vm2994_vm3, %v2483_v3, -1e+30  ;;  %v460_v60 = vsel %vm2999_vm4, %v2464_v19, -1e+30  ;;  %v1044_v35 = vmul.f32 %v2513_v34, %v2483_v3 }
 0x107   :  { %1181 = vst.msk [vmem:[#allocation5 + $0x40] sm:$0xff] %vm21_vm10, %v1165_v16 }
 0x108   :  { %1183 = vst.msk [vmem:[#allocation5 + $0x50] sm:$0xff] %vm21_vm10, %v1167_v62 }
 0x109   :  { %28 = vst.msk [vmem:[#allocation2 + $0x30] sm:$0xff] %vm21_vm10, %v1897_v5 }
 0x10a   :  { %1049 = vadd.xlane.f32.xlu0 %v1031_v46  ;;  %29 = vst.msk [vmem:[#allocation2 + $0x38] sm:$0xff] %vm21_vm10, %v1897_v5 }
 0x10b   :  { %1067 = vadd.xlane.f32.xlu1 %v1040_v41  ;;  %v1144_v0 = vpop.xlane.xlu1 %1143  ;;  %v1148_v56 = vpop.xlane.xlu2 %1147  ;;  %30 = vst.msk [vmem:[#allocation2 + $0x40] sm:$0xff] %vm21_vm10, %v1897_v5  ;;  %v2540_v51 = vld [vmem:[#allocation2 + $0x20] sm:$0xff] }
 0x10c   :  { %v1166_v63 = vadd.f32 %v1144_v0, %v1118_v7  ;;  %1051 = vadd.xlane.f32.xlu2 %v1032_v25  ;;  %v1168_v26 = vadd.f32 %v1148_v56, %v1120_v55  ;;  %31 = vst.msk [vmem:[#allocation2 + $0x48] sm:$0xff] %vm21_vm10, %v1897_v5 }
 0x10d   :  { %32 = vst.msk [vmem:[#allocation2 + $0x50] sm:$0xff] %vm21_vm10, %v1897_v5 }
 0x10e   :  { %1182 = vst.msk [vmem:[#allocation5 + $0x48] sm:$0xff] %vm21_vm10, %v1166_v63 }
 0x10f   :  { %1184 = vst.msk [vmem:[#allocation5 + $0x58] sm:$0xff] %vm21_vm10, %v1168_v26 }
 0x110   :  { %33 = vst.msk [vmem:[#allocation2 + $0x58] sm:$0xff] %vm21_vm10, %v1897_v5 }
 0x111   :  { %34 = vst.msk [vmem:[#allocation2 + $0x60] sm:$0xff] %vm21_vm10, %v1897_v5 }
 0x112   :  { %706 = vmax.xlane.f32.xlu0 %v464_v11  ;;  %35 = vst.msk [vmem:[#allocation2 + $0x68] sm:$0xff] %vm21_vm10, %v1897_v5  ;;  %v2542_v7 = vld [vmem:[#allocation2 + $0x40] sm:$0xff] }
 0x113   :  { %v1150_v50 = vpop.xlane.xlu1 %1149  ;;  %36 = vst.msk [vmem:[#allocation2 + $0x70] sm:$0xff] %vm21_vm10, %v1897_v5  ;;  %v1017_v11 = vld [vmem:[#allocation4 + $0x20] sm:$0xff]  ;;  %v2604_v56 = vld [vmem:[#allocation2 + $0x48] sm:$0xff] }
 0x114   :  { %v1169_v38 = vadd.f32 %v1150_v50, %v1121_v12  ;;  %698 = vmax.xlane.f32.xlu2 %v460_v60  ;;  %37 = vst.msk [vmem:[#allocation2 + $0x78] sm:$0xff] %vm21_vm10, %v1897_v5  ;;  %v1021_v5 = vld [vmem:[#allocation4 + $0x40] sm:$0xff]  ;;  %v2568_v50 = vld [vmem:[#allocation2 + $0x8] sm:$0xff] }
 0x115   :  { %3000 = vst [vmem:[#allocation6_spill] sm:$0xff] %v2604_v56 }
 0x116   :  { %1185 = vst.msk [vmem:[#allocation5 + $0x60] sm:$0xff] %vm21_vm10, %v1169_v38 }
 0x118   :  { %v2538_v46 = vld [vmem:[#allocation2 + $0x60] sm:$0xff] }
 0x11a   :  { %1075 = vadd.xlane.f32.xlu0 %v1044_v35  ;;  %v2624_v1 = vld [vmem:[#allocation2 + $0x70] sm:$0xff] }
 0x11b   :  { %3004 = vst [vmem:[#allocation10_spill] sm:$0xff] %v2624_v1 }
 0x136   :  { %v677_v31 = vpop.xlane.xlu1 %676 }
 0x137   :  { %v2530_v2 = vmax.f32 %v2527_v18, %v677_v31  ;;  %v1046_v22 = vpop.xlane.xlu2 %1045 }
 0x138   :  { %v1077_v33 = vadd.f32 %v1046_v22, %v1013_v24 }
 0x139   :  { %997 = vst.msk [vmem:[#allocation2] sm:$0xff] %vm21_vm10, %v2530_v2  ;;  %774 = vperm.xlu1 %1820, %v2530_v2  }
 0x13a   :  { %1093 = vst.msk [vmem:[#allocation4] sm:$0xff] %vm21_vm10, %v1077_v33  ;;  %v1025_v33 = vld [vmem:[#allocation4 + $0x60] sm:$0xff] }
 0x13d   :  { %v701_v41 = vpop.xlane.xlu0 %700 }
 0x13e   :  { %v2545_v55 = vmax.f32 %v2538_v46, %v701_v41  ;;  %v685_v62 = vpop.xlane.xlu1 %684  ;;  %v1014_v41 = vld [vmem:[#allocation4 + $0x8] sm:$0xff] }
 0x13f   :  { %v2548_v25 = vmax.f32 %v2540_v51, %v685_v62  ;;  %v693_v0 = vpop.xlane.xlu2 %692 }
 0x140   :  { %1009 = vst.msk [vmem:[#allocation2 + $0x60] sm:$0xff] %vm21_vm10, %v2545_v55  ;;  %v2555_v21 = vmax.f32 %v2542_v7, %v693_v0  ;;  %v2580_v0 = vld [vmem:[#allocation2 + $0x28] sm:$0xff] }
 0x141   :  { %1001 = vst.msk [vmem:[#allocation2 + $0x20] sm:$0xff] %vm21_vm10, %v2548_v25  ;;  %834 = vperm.xlu1 %1820, %v2545_v55   ;;  %794 = vperm.xlu0 %1819, %v2548_v25  }
 0x142   :  { %1005 = vst.msk [vmem:[#allocation2 + $0x40] sm:$0xff] %vm21_vm10, %v2555_v21  ;;  %814 = vperm.xlu2 %1821, %v2555_v21  }
 0x145   :  { %v1062_v12 = vpop.xlane.xlu0 %1061 }
 0x146   :  { %v1085_v60 = vadd.f32 %v1062_v12, %v1021_v5  ;;  %v1054_v38 = vpop.xlane.xlu1 %1053 }
 0x147   :  { %v1081_v35 = vadd.f32 %v1054_v38, %v1017_v11  ;;  %v679_v24 = vpop.xlane.xlu2 %678 }
 0x148   :  { %1101 = vst.msk [vmem:[#allocation4 + $0x40] sm:$0xff] %vm21_vm10, %v1085_v60  ;;  %v2572_v31 = vmax.f32 %v2568_v50, %v679_v24  ;;  %v1018_v24 = vld [vmem:[#allocation4 + $0x28] sm:$0xff] }
 0x149   :  { %1097 = vst.msk [vmem:[#allocation4 + $0x20] sm:$0xff] %vm21_vm10, %v1081_v35 }
 0x14a   :  { %998 = vst.msk [vmem:[#allocation2 + $0x8] sm:$0xff] %vm21_vm10, %v2572_v31  ;;  %779 = vperm.xlu2 %1821, %v2572_v31  }
 0x14d   :  { %v1070_v62 = vpop.xlane.xlu0 %1069 }
 0x14e   :  { %v1089_v5 = vadd.f32 %v1070_v62, %v1025_v33  ;;  %v1048_v11 = vpop.xlane.xlu1 %1047  ;;  %v2592_v33 = vld [vmem:[#allocation2 + $0x68] sm:$0xff] }
 0x14f   :  { %v1078_v12 = vadd.f32 %v1048_v11, %v1014_v41  ;;  %v687_v60 = vpop.xlane.xlu2 %686  ;;  %v1026_v62 = vld [vmem:[#allocation4 + $0x68] sm:$0xff] }
 0x150   :  { %1105 = vst.msk [vmem:[#allocation4 + $0x60] sm:$0xff] %vm21_vm10, %v1089_v5  ;;  %v2584_v38 = vmax.f32 %v2580_v0, %v687_v60 }
 0x151   :  { %1094 = vst.msk [vmem:[#allocation4 + $0x8] sm:$0xff] %vm21_vm10, %v1078_v12 }
 0x152   :  { %1002 = vst.msk [vmem:[#allocation2 + $0x28] sm:$0xff] %vm21_vm10, %v2584_v38  ;;  %799 = vperm.xlu2 %1821, %v2584_v38  }
 0x155   :  { %v1056_v41 = vpop.xlane.xlu0 %1055 }
 0x156   :  { %v1082_v11 = vadd.f32 %v1056_v41, %v1018_v24  ;;  %v703_v5 = vpop.xlane.xlu1 %702  ;;  %v2606_v24 = vld [vmem:[#allocation2 + $0x50] sm:$0xff] }
 0x157   :  { %v2595_v60 = vmax.f32 %v2592_v33, %v703_v5  ;;  %v1072_v22 = vpop.xlane.xlu2 %1071  ;;  %3001 = vst [vmem:[#allocation7_spill] sm:$0xff] %v2606_v24  ;;  %v1019_v5 = vld [vmem:[#allocation4 + $0x30] sm:$0xff] }
 0x158   :  { %1098 = vst.msk [vmem:[#allocation4 + $0x28] sm:$0xff] %vm21_vm10, %v1082_v11  ;;  %v1090_v12 = vadd.f32 %v1072_v22, %v1026_v62 }
 0x159   :  { %1010 = vst.msk [vmem:[#allocation2 + $0x68] sm:$0xff] %vm21_vm10, %v2595_v60  ;;  %839 = vperm.xlu0 %1819, %v2595_v60  }
 0x15a   :  { %1106 = vst.msk [vmem:[#allocation4 + $0x68] sm:$0xff] %vm21_vm10, %v1090_v12 }
 0x15d   :  { %v695_v41 = vpop.xlane.xlu0 %694 }
 0x15e   :  { %v2609_v35 = vmax.f32 %v2604_v56, %v695_v41  ;;  %v697_v22 = vpop.xlane.xlu1 %696  ;;  %v1022_v41 = vld [vmem:[#allocation4 + $0x48] sm:$0xff] }
 0x15f   :  { %v2612_v62 = vmax.f32 %v2606_v24, %v697_v22  ;;  %v1058_v11 = vpop.xlane.xlu2 %1057  ;;  %v1027_v22 = vld [vmem:[#allocation4 + $0x70] sm:$0xff] }
 0x160   :  { %3002 = vst [vmem:[#allocation8_spill] sm:$0xff] %v2609_v35  ;;  %819 = vperm.xlu1 %1820, %v2609_v35   ;;  %v1083_v12 = vadd.f32 %v1058_v11, %v1019_v5 }
 0x161   :  { %3003 = vst [vmem:[#allocation9_spill] sm:$0xff] %v2612_v62 }
 0x162   :  { %1006 = vst.msk [vmem:[#allocation2 + $0x48] sm:$0xff] %vm21_vm10, %v2609_v35 }
 0x163   :  { %1007 = vst.msk [vmem:[#allocation2 + $0x50] sm:$0xff] %vm21_vm10, %v2612_v62 }
 0x164   :  { %1099 = vst.msk [vmem:[#allocation4 + $0x30] sm:$0xff] %vm21_vm10, %v1083_v12  ;;  %v2636_v12 = vld [vmem:[#allocation2 + $0x10] sm:$0xff] }
 0x165   :  { %v1064_v26 = vpop.xlane.xlu0 %1063  ;;  %3006 = vst [vmem:[#allocation12_spill] sm:$0xff] %v2636_v12 }
 0x166   :  { %v1086_v63 = vadd.f32 %v1064_v26, %v1022_v41  ;;  %v1074_v54 = vpop.xlane.xlu1 %1073  ;;  %v2638_v26 = vld [vmem:[#allocation2 + $0x38] sm:$0xff]  ;;  %v1023_v41 = vld [vmem:[#allocation4 + $0x50] sm:$0xff] }
 0x167   :  { %v1091_v45 = vadd.f32 %v1074_v54, %v1027_v22  ;;  %v705_v56 = vpop.xlane.xlu2 %704  ;;  %3007 = vst [vmem:[#allocation13_spill] sm:$0xff] %v2638_v26 }
 0x168   :  { %1102 = vst.msk [vmem:[#allocation4 + $0x48] sm:$0xff] %vm21_vm10, %v1086_v63  ;;  %v2628_v5 = vmax.f32 %v2624_v1, %v705_v56  ;;  %v2658_v1 = vld [vmem:[#allocation2 + $0x18] sm:$0xff] }
 0x169   :  { %1107 = vst.msk [vmem:[#allocation4 + $0x70] sm:$0xff] %vm21_vm10, %v1091_v45 }
 0x16a   :  { %3005 = vst [vmem:[#allocation11_spill] sm:$0xff] %v2628_v5  ;;  %844 = vperm.xlu2 %1821, %v2628_v5  }
 0x16b   :  { %1011 = vst.msk [vmem:[#allocation2 + $0x70] sm:$0xff] %vm21_vm10, %v2628_v5 }
 0x16c   :  { %3010 = vst [vmem:[#allocation16_spill] sm:$0xff] %v2658_v1 }
 0x16d   :  { %v681_v54 = vpop.xlane.xlu0 %680 }
 0x16e   :  { %v2641_v63 = vmax.f32 %v2636_v12, %v681_v54  ;;  %v691_v56 = vpop.xlane.xlu1 %690  ;;  %v2656_v54 = vld [vmem:[#allocation2 + $0x30] sm:$0xff] }
 0x16f   :  { %v2644_v45 = vmax.f32 %v2638_v26, %v691_v56  ;;  %v1066_v22 = vpop.xlane.xlu2 %1065  ;;  %3009 = vst [vmem:[#allocation15_spill] sm:$0xff] %v2656_v54  ;;  %v1020_v56 = vld [vmem:[#allocation4 + $0x38] sm:$0xff] }
 0x170   :  { %3008 = vst [vmem:[#allocation14_spill] sm:$0xff] %v2641_v63  ;;  %v1087_v11 = vadd.f32 %v1066_v22, %v1023_v41  ;;  %784 = vperm.xlu0 %1819, %v2641_v63   ;;  %v1016_v26 = vld [vmem:[#allocation4 + $0x18] sm:$0xff] }
 0x171   :  { %999 = vst.msk [vmem:[#allocation2 + $0x10] sm:$0xff] %vm21_vm10, %v2641_v63 }
 0x172   :  { %1004 = vst.msk [vmem:[#allocation2 + $0x38] sm:$0xff] %vm21_vm10, %v2644_v45 }
 0x173   :  { %1103 = vst.msk [vmem:[#allocation4 + $0x50] sm:$0xff] %vm21_vm10, %v1087_v11 }
 0x175   :  { %v689_v5 = vpop.xlane.xlu0 %688 }
 0x176   :  { %v2661_v16 = vmax.f32 %v2656_v54, %v689_v5  ;;  %v1060_v41 = vpop.xlane.xlu1 %1059 }
 0x177   :  { %v1084_v22 = vadd.f32 %v1060_v41, %v1020_v56  ;;  %v683_v63 = vpop.xlane.xlu2 %682  ;;  %v1015_v56 = vld [vmem:[#allocation4 + $0x10] sm:$0xff]  ;;  %v1024_v41 = vld [vmem:[#allocation4 + $0x58] sm:$0xff] }
 0x178   :  { %1003 = vst.msk [vmem:[#allocation2 + $0x30] sm:$0xff] %vm21_vm10, %v2661_v16  ;;  %824 = vperm.xlu0 %1819, %v2612_v62   ;;  %804 = vperm.xlu1 %1820, %v2661_v16   ;;  %v2670_v11 = vmax.f32 %v2658_v1, %v683_v63  ;;  %v2684_v1 = vld [vmem:[#allocation2 + $0x58] sm:$0xff] }
 0x179   :  { %1100 = vst.msk [vmem:[#allocation4 + $0x38] sm:$0xff] %vm21_vm10, %v1084_v22  ;;  %v2682_v22 = vld [vmem:[#allocation2 + $0x78] sm:$0xff] }
 0x17a   :  { %1000 = vst.msk [vmem:[#allocation2 + $0x18] sm:$0xff] %vm21_vm10, %v2670_v11 }
 0x17b   :  { %3011 = vst [vmem:[#allocation17_spill] sm:$0xff] %v2682_v22 }
 0x17d   :  { %v1050_v24 = vpop.xlane.xlu0 %1049 }
 0x17e   :  { %v1079_v54 = vadd.f32 %v1050_v24, %v1015_v56  ;;  %v1068_v12 = vpop.xlane.xlu1 %1067 }
 0x17f   :  { %v1088_v62 = vadd.f32 %v1068_v12, %v1024_v41  ;;  %v1052_v35 = vpop.xlane.xlu2 %1051 }
 0x180   :  { %1095 = vst.msk [vmem:[#allocation4 + $0x10] sm:$0xff] %vm21_vm10, %v1079_v54  ;;  %809 = vperm.xlu0 %1819, %v2644_v45   ;;  %789 = vperm.xlu1 %1820, %v2670_v11   ;;  %v1080_v63 = vadd.f32 %v1052_v35, %v1016_v26  ;;  %v1028_v26 = vld [vmem:[#allocation4 + $0x78] sm:$0xff] }
 0x181   :  { %1104 = vst.msk [vmem:[#allocation4 + $0x58] sm:$0xff] %vm21_vm10, %v1088_v62 }
 0x182   :  { %1096 = vst.msk [vmem:[#allocation4 + $0x18] sm:$0xff] %vm21_vm10, %v1080_v63  ;;  %v473_v63 = vsel %vm2153_vm14, %v2254_v42, -1e+30 }
 0x185   :  { %v707_v5 = vpop.xlane.xlu0 %706 }
 0x186   :  { %v2687_v24 = vmax.f32 %v2682_v22, %v707_v5  ;;  %v3013_v22 = vmov 0.0  }
 0x187   :  { %v699_v12 = vpop.xlane.xlu2 %698  ;;  %1660 = vst.msk [vmem:[%s2921_s4 + $0x10] sm:$0xff] %vm21_vm10, %v3013_v22 }
 0x188   :  { %3012 = vst [vmem:[#allocation18_spill] sm:$0xff] %v2687_v24  ;;  %849 = vperm.xlu1 %1820, %v2687_v24   ;;  %v2695_v35 = vmax.f32 %v2684_v1, %v699_v12 }
 0x189   :  { %1012 = vst.msk [vmem:[#allocation2 + $0x78] sm:$0xff] %vm21_vm10, %v2687_v24 }
 0x18a   :  { %v735_v62 = vsub.f32 %v2684_v1, %v2695_v35  ;;  %1008 = vst.msk [vmem:[#allocation2 + $0x58] sm:$0xff] %vm21_vm10, %v2695_v35  ;;  %829 = vperm.xlu2 %1821, %v2695_v35  }
 0x18b   :  { %1661 = vst.msk [vmem:[%s2921_s4 + $0x18] sm:$0xff] %vm21_vm10, %v3013_v22 }
 0x18c   :  { %1662 = vst.msk [vmem:[%s2921_s4 + $0x20] sm:$0xff] %vm21_vm10, %v3013_v22 }
 0x18d   :  { %v1076_v5 = vpop.xlane.xlu0 %1075  ;;  %1663 = vst.msk [vmem:[%s2921_s4 + $0x28] sm:$0xff] %vm21_vm10, %v3013_v22 }
 0x18e   :  { %v1092_v56 = vadd.f32 %v1076_v5, %v1028_v26  ;;  %v470_v5 = vsel %vm2093_vm5, %v2294_v8, -1e+30  ;;  %1664 = vst.msk [vmem:[%s2921_s4 + $0x30] sm:$0xff] %vm21_vm10, %v3013_v22  ;;  %vm3020_vm5 = vnez %v2954_v61 }
 0x18f   :  { %1665 = vst.msk [vmem:[%s2921_s4 + $0x38] sm:$0xff] %vm21_vm10, %v3013_v22 }
 0x190   :  { %1108 = vst.msk [vmem:[#allocation4 + $0x78] sm:$0xff] %vm21_vm10, %v1092_v56 }
 0x191   :  { %1666 = vst.msk [vmem:[%s2921_s4 + $0x40] sm:$0xff] %vm21_vm10, %v3013_v22 }
 0x192   :  { %1667 = vst.msk [vmem:[%s2921_s4 + $0x48] sm:$0xff] %vm21_vm10, %v3013_v22 }
 0x193   :  { %1668 = vst.msk [vmem:[%s2921_s4 + $0x50] sm:$0xff] %vm21_vm10, %v3013_v22 }
 0x194   :  { %1669 = vst.msk [vmem:[%s2921_s4 + $0x58] sm:$0xff] %vm21_vm10, %v3013_v22 }
 0x195   :  { %1670 = vst.msk [vmem:[%s2921_s4 + $0x60] sm:$0xff] %vm21_vm10, %v3013_v22 }
 0x196   :  { %1671 = vst.msk [vmem:[%s2921_s4 + $0x68] sm:$0xff] %vm21_vm10, %v3013_v22 }
 0x197   :  { %1672 = vst.msk [vmem:[%s2921_s4 + $0x70] sm:$0xff] %vm21_vm10, %v3013_v22 }
 0x198   :  { %1673 = vst.msk [vmem:[%s2921_s4 + $0x78] sm:$0xff] %vm21_vm10, %v3013_v22  ;;  %v3015_v22 = vsel %vm2216_vm6, %v2272_v59, -1e+30 }
 0x19c   :  { %v815_v41 = vpop.permute.xlu2 %814 }
 0x19d   :  { %v860_v12 = vsub.f32 %v473_v63, %v815_v41  ;;  %v469_v41 = vsel %vm2062_vm11, %v2252_v37, -1e+30  ;;  %vm3018_vm11 = vnez %v2963_v15 }
 0x19e   :  { %v475_v47 = vsel %vm3018_vm11, %v2343_v30, -1e+30  ;;  %v468_v30 = vsel %vm3020_vm5, %v2446_v40, -1e+30 }
 0x19f   :  { %v884_v24 = vmul.f32 1.442695, %v860_v12  ;;  %v3014_v12 = vsel %vm2229_vm1, %v2256_v43, -1e+30  ;;  %v466_v43 = vsel %vm2081_vm0, %v2270_v58, -1e+30  ;;  %vm3019_vm0 = vnez %v2956_v4 }
 0x1a0   :  { %v474_v58 = vsel %vm2185_vm9, %v2337_v27, -1e+30  ;;  %vm3017_vm9 = vnez %v2958_v6  ;;  %v472_v15 = vsel %vm3019_vm0, %v2421_v13, -1e+30  ;;  %v480_v4 = vsel %vm2492_vm7, %v2483_v3, -1e+30 }
 0x1a1   :  { %1823 = vpow2.f32 %v884_v24  ;;  %v3021_v3 = vsub.f32 %v2542_v7, %v2555_v21 }
 0x1a3   :  { %v756_v9 = vmul.f32 1.442695, %v3021_v3  ;;  %v1192_v3 = vld [vmem:[#allocation2] sm:$0xff] }
 0x1a4   :  { %v780_v54 = vpop.permute.xlu2 %779 }
 0x1a7   :  { %v1824_v8 = vpop.eup %1823 }
 0x1ab   :  { %v775_v42 = vpop.permute.xlu1 %774 }
 0x1ac   :  { %v852_v26 = vsub.f32 %v465_v10, %v775_v42  ;;  %v800_v56 = vpop.permute.xlu2 %799 }
 0x1ad   :  { %v857_v39 = vsub.f32 %v470_v5, %v800_v56  ;;  %v853_v5 = vsub.f32 %v466_v43, %v780_v54 }
 0x1ae   :  { %v868_v32 = vmul.f32 1.442695, %v852_v26 }
 0x1af   :  { %v878_v57 = vmul.f32 1.442695, %v857_v39  ;;  %v870_v56 = vmul.f32 1.442695, %v853_v5 }
 0x1b0   :  { %1825 = vpow2.f32 %v868_v32 }
 0x1b1   :  { %1827 = vpow2.f32 %v878_v57 }
 0x1b2   :  { %948 = vadd.xlane.f32.xlu1 %v1824_v8 }
 0x1b3   :  { %v835_v24 = vpop.permute.xlu1 %834  ;;  %v795_v63 = vpop.permute.xlu0 %794 }
 0x1b4   :  { %v864_v10 = vsub.f32 %v3014_v12, %v835_v24  ;;  %v856_v42 = vsub.f32 %v469_v41, %v795_v63 }
 0x1b6   :  { %v1826_v49 = vpop.eup %1825  ;;  %v892_v37 = vmul.f32 1.442695, %v864_v10  ;;  %v876_v26 = vmul.f32 1.442695, %v856_v42 }
 0x1b7   :  { %v1828_v28 = vpop.eup %1827  ;;  %932 = vadd.xlane.f32.xlu0 %v1826_v49 }
 0x1b8   :  { %1829 = vpow2.f32 %v892_v37 }
 0x1b9   :  { %1831 = vpow2.f32 %v876_v26 }
 0x1ba   :  { %942 = vadd.xlane.f32.xlu1 %v1828_v28  ;;  %1833 = vpow2.f32 %v870_v56  ;;  %v471_v28 = vsel %vm3017_vm9, %v2341_v29, -1e+30 }
 0x1be   :  { %v1830_v39 = vpop.eup %1829 }
 0x1bf   :  { %v1832_v32 = vpop.eup %1831  ;;  %956 = vadd.xlane.f32.xlu0 %v1830_v39 }
 0x1c0   :  { %940 = vadd.xlane.f32.xlu2 %v1832_v32  ;;  %v1834_v57 = vpop.eup %1833 }
 0x1c4   :  { %v845_v42 = vpop.permute.xlu2 %844 }
 0x1c5   :  { %v866_v37 = vsub.f32 %v479_v17, %v845_v42 }
 0x1c7   :  { %v896_v26 = vmul.f32 1.442695, %v866_v37  ;;  %v3025_v37 = vsub.f32 %v2540_v51, %v2548_v25  ;;  %v3026_v51 = vsub.f32 %v2568_v50, %v2572_v31 }
 0x1c8   :  { %934 = vadd.xlane.f32.xlu2 %v1834_v57 }
 0x1c9   :  { %v742_v25 = vmul.f32 1.442695, %v3026_v51 }
 0x1cb   :  { %v840_v8 = vpop.permute.xlu0 %839 }
 0x1cc   :  { %v865_v24 = vsub.f32 %v3015_v22, %v840_v8 }
 0x1ce   :  { %v894_v53 = vmul.f32 1.442695, %v865_v24 }
 0x1d0   :  { %1835 = vpow2.f32 %v894_v53 }
 0x1d2   :  { %v820_v54 = vpop.permute.xlu1 %819 }
 0x1d3   :  { %v861_v41 = vsub.f32 %v474_v58, %v820_v54 }
 0x1d5   :  { %v886_v63 = vmul.f32 1.442695, %v861_v41 }
 0x1d6   :  { %v1836_v12 = vpop.eup %1835 }
 0x1d7   :  { %1837 = vpow2.f32 %v886_v63  ;;  %958 = vadd.xlane.f32.xlu2 %v1836_v12 }
 0x1dd   :  { %v1838_v10 = vpop.eup %1837 }
 0x1de   :  { %950 = vadd.xlane.f32.xlu0 %v1838_v10 }
 0x1e2   :  { %v785_v59 = vpop.permute.xlu0 %784 }
 0x1e3   :  { %v854_v49 = vsub.f32 %v467_v23, %v785_v59  ;;  %v3022_v59 = vsub.f32 %v2527_v18, %v2530_v2  ;;  %v748_v18 = vmul.f32 1.442695, %v3025_v37 }
 0x1e4   :  { %v830_v5 = vpop.permute.xlu2 %829 }
 0x1e5   :  { %v872_v27 = vmul.f32 1.442695, %v854_v49  ;;  %v863_v8 = vsub.f32 %v476_v36, %v830_v5  ;;  %v740_v42 = vmul.f32 1.442695, %v3022_v59  ;;  %v3023_v49 = vsub.f32 %v2580_v0, %v2584_v38  ;;  %v900_v0 = vld [vmem:[#allocation3] sm:$0xff] }
 0x1e6   :  { %v912_v36 = vld [vmem:[#allocation3 + $0x60] sm:$0xff] }
 0x1e7   :  { %1839 = vpow2.f32 %v872_v27  ;;  %v890_v6 = vmul.f32 1.442695, %v863_v8  ;;  %v750_v17 = vmul.f32 1.442695, %v3023_v49  ;;  %v908_v27 = vld [vmem:[#allocation3 + $0x40] sm:$0xff] }
 0x1e8   :  { %1841 = vpow2.f32 %v896_v26 }
 0x1ea   :  { %v805_v43 = vpop.permute.xlu1 %804  ;;  %v825_v52 = vpop.permute.xlu0 %824 }
 0x1eb   :  { %v858_v56 = vsub.f32 %v471_v28, %v805_v43  ;;  %v862_v39 = vsub.f32 %v475_v47, %v825_v52  ;;  %v905_v47 = vld [vmem:[#allocation3 + $0x28] sm:$0xff] }
 0x1ed   :  { %v1840_v32 = vpop.eup %1839  ;;  %v880_v44 = vmul.f32 1.442695, %v858_v56  ;;  %v888_v57 = vmul.f32 1.442695, %v862_v39 }
 0x1ee   :  { %936 = vadd.xlane.f32.xlu1 %v1840_v32  ;;  %v1842_v24 = vpop.eup %1841 }
 0x1ef   :  { %1843 = vpow2.f32 %v880_v44 }
 0x1f0   :  { %1845 = vpow2.f32 %v888_v57  ;;  %v904_v57 = vld [vmem:[#allocation3 + $0x20] sm:$0xff] }
 0x1f1   :  { %1847 = vpow2.f32 %v890_v6 }
 0x1f2   :  { %v810_v29 = vpop.permute.xlu0 %809  ;;  %v790_v22 = vpop.permute.xlu1 %789 }
 0x1f3   :  { %v859_v20 = vsub.f32 %v472_v15, %v810_v29  ;;  %v855_v19 = vsub.f32 %v468_v30, %v790_v22 }
 0x1f5   :  { %v1844_v53 = vpop.eup %1843  ;;  %v882_v58 = vmul.f32 1.442695, %v859_v20  ;;  %v874_v54 = vmul.f32 1.442695, %v855_v19  ;;  %v2851_v19 = vld [vmem:[#allocation5 + $0x8] sm:$0xff] }
 0x1f6   :  { %v1846_v41 = vpop.eup %1845  ;;  %944 = vadd.xlane.f32.xlu0 %v1844_v53  ;;  %960 = vadd.xlane.f32.xlu1 %v1842_v24  ;;  %v901_v53 = vld [vmem:[#allocation3 + $0x8] sm:$0xff]  ;;  %vm1356_vm15 = vweird.f32 %v2851_v19 }
 0x1f7   :  { %1849 = vpow2.f32 %v882_v58  ;;  %952 = vadd.xlane.f32.xlu2 %v1846_v41  ;;  %v1848_v40 = vpop.eup %1847 }
 0x1f8   :  { %1851 = vpow2.f32 %v874_v54 }
 0x1fa   :  { %v850_v61 = vpop.permute.xlu1 %849 }
 0x1fb   :  { %v867_v13 = vsub.f32 %v480_v4, %v850_v61 }
 0x1fd   :  { %v1850_v63 = vpop.eup %1849  ;;  %v898_v12 = vmul.f32 1.442695, %v867_v13 }
 0x1fe   :  { %v1852_v10 = vpop.eup %1851  ;;  %954 = vadd.xlane.f32.xlu1 %v1848_v40 }
 0x1ff   :  { %1853 = vpow2.f32 %v898_v12  ;;  %938 = vadd.xlane.f32.xlu0 %v1852_v10  ;;  %946 = vadd.xlane.f32.xlu2 %v1850_v63  ;;  %v3027_v63 = vsub.f32 %v2592_v33, %v2595_v60  ;;  %v3028_v60 = vld [vmem:[#allocation6_spill] sm:$0xff] }
 0x200   :  { %1855 = vpow2.f32 %v756_v9 }
 0x201   :  { %1857 = vpow2.f32 %v740_v42  ;;  %v766_v12 = vmul.f32 1.442695, %v3027_v63 }
 0x202   :  { %1859 = vpow2.f32 %v750_v17 }
 0x205   :  { %v1854_v23 = vpop.eup %1853 }
 0x206   :  { %1155 = vadd.xlane.f32.xlu1 %v2513_v34  ;;  %v1856_v34 = vpop.eup %1855 }
 0x207   :  { %962 = vadd.xlane.f32.xlu0 %v1854_v23  ;;  %1153 = vadd.xlane.f32.xlu2 %v2392_v48  ;;  %v2835_v48 = vld [vmem:[#allocation5] sm:$0xff]  ;;  %v924_v21 = vmul.f32 %v1856_v34, %v908_v27  ;;  %v1858_v26 = vpop.eup %1857 }
 0x208   :  { %1861 = vrcp.f32 %v2835_v48  ;;  %v1860_v38 = vpop.eup %1859  ;;  %v916_v43 = vmul.f32 %v1858_v26, %v900_v0  ;;  %vm1341_vm14 = vweird.f32 %v2835_v48  ;;  %v1345_v4 = vand.u32 2147483647, %v2835_v48  ;;  %v1288_v27 = vld [vmem:[#allocation4] sm:$0xff] }
 0x209   :  { %v921_v52 = vmul.f32 %v1860_v38, %v905_v47  ;;  %v1347_v61 = vand.u32 2147483648, %v2835_v48  ;;  %v913_v38 = vld [vmem:[#allocation3 + $0x68] sm:$0xff] }
 0x20a   :  { %vm1346_vm1 = vcmp.eq.f32.partialorder %v1345_v4, 8.507059e+37 }
 0x20b   :  { %v1348_v42 = vor.u32 1.1754944e-38, %v1347_v61 }
 0x20e   :  { %v1862_v5 = vpop.eup %1861 }
 0x20f   :  { %1151 = vadd.xlane.f32.xlu0 %v2322_v14  ;;  %v3024_v14 = vsub.f32 %v2538_v46, %v2545_v55  ;;  %v1337_v8 = vmul.f32 %v1862_v5, %v2835_v48  ;;  %vm1342_vm6 = vweird.f32 %v1862_v5 }
 0x210   :  { %vm1343_vm12 = vmor %vm1341_vm14, %vm1342_vm6 }
 0x211   :  { %v764_v7 = vmul.f32 1.442695, %v3024_v14  ;;  %v1338_v50 = vsub.f32 1.0, %v1337_v8 }
 0x213   :  { %1863 = vpow2.f32 %v764_v7  ;;  %v1339_v58 = vmul.f32 %v1862_v5, %v1338_v50  ;;  %v3029_v7 = vld [vmem:[#allocation8_spill] sm:$0xff]  ;;  %v3032_v50 = vld [vmem:[#allocation14_spill] sm:$0xff] }
 0x214   :  { %1865 = vpow2.f32 %v748_v18 }
 0x215   :  { %1867 = vpow2.f32 %v742_v25  ;;  %v1340_v40 = vadd.f32 %v1862_v5, %v1339_v58  ;;  %v1360_v25 = vand.u32 2147483647, %v2851_v19 }
 0x217   :  { %v1344_v49 = vsel %vm1343_vm12, %v1862_v5, %v1340_v40  ;;  %vm1361_vm3 = vcmp.eq.f32.partialorder %v1360_v25, 8.507059e+37  ;;  %v911_v25 = vld [vmem:[#allocation3 + $0x58] sm:$0xff] }
 0x218   :  { %v1349_v33 = vsel %vm1346_vm1, %v1348_v42, %v1344_v49 }
 0x219   :  { %v1864_v39 = vpop.eup %1863 }
 0x21a   :  { %v1866_v44 = vpop.eup %1865  ;;  %v928_v6 = vmul.f32 %v1864_v39, %v912_v36  ;;  %v909_v39 = vld [vmem:[#allocation3 + $0x48] sm:$0xff] }
 0x21b   :  { %v920_v29 = vmul.f32 %v1866_v44, %v904_v57  ;;  %v1868_v24 = vpop.eup %1867 }
 0x21c   :  { %v917_v54 = vmul.f32 %v1868_v24, %v901_v53 }
 0x225   :  { %v949_v2 = vpop.xlane.xlu1 %948 }
 0x226   :  { %v972_v28 = vadd.f32 %v949_v2, %v924_v21  ;;  %v3030_v21 = vsub.f32 %v3028_v60, %v3029_v7  ;;  %v3044_v60 = vld [vmem:[#allocation16_spill] sm:$0xff] }
 0x227   :  { %v3045_v7 = vsub.f32 %v3044_v60, %v2670_v11 }
 0x228   :  { %989 = vst.msk [vmem:[#allocation3 + $0x40] sm:$0xff] %vm21_vm10, %v972_v28  ;;  %v758_v37 = vmul.f32 1.442695, %v3030_v21 }
 0x229   :  { %v746_v21 = vmul.f32 1.442695, %v3045_v7 }
 0x22a   :  { %v933_v46 = vpop.xlane.xlu0 %932 }
 0x22b   :  { %v964_v55 = vadd.f32 %v933_v46, %v916_v43 }
 0x22d   :  { %981 = vst.msk [vmem:[#allocation3] sm:$0xff] %vm21_vm10, %v964_v55  ;;  %v943_v56 = vpop.xlane.xlu1 %942 }
 0x22e   :  { %v969_v32 = vadd.f32 %v943_v56, %v921_v52  ;;  %v1362_v52 = vand.u32 2147483648, %v2851_v19 }
 0x230   :  { %986 = vst.msk [vmem:[#allocation3 + $0x28] sm:$0xff] %vm21_vm10, %v969_v32  ;;  %v1193_v32 = vld [vmem:[#allocation2 + $0x8] sm:$0xff]  ;;  %v1363_v44 = vor.u32 1.1754944e-38, %v1362_v52 }
 0x232   :  { %v957_v15 = vpop.xlane.xlu0 %956 }
 0x233   :  { %v976_v30 = vadd.f32 %v957_v15, %v928_v6  ;;  %v941_v22 = vpop.xlane.xlu2 %940 }
 0x234   :  { %v1208_v31 = vld [vmem:[#allocation3] sm:$0xff]  ;;  %v968_v20 = vadd.f32 %v941_v22, %v920_v29  ;;  %v1289_v29 = vld [vmem:[#allocation4 + $0x8] sm:$0xff]  ;;  %v3031_v22 = vld [vmem:[#allocation12_spill] sm:$0xff] }
 0x235   :  { %1869 = vlog2.f32 %v1208_v31  ;;  %993 = vst.msk [vmem:[#allocation3 + $0x60] sm:$0xff] %vm21_vm10, %v976_v30  ;;  %v3033_v31 = vsub.f32 %v3031_v22, %v3032_v50 }
 0x236   :  { %985 = vst.msk [vmem:[#allocation3 + $0x20] sm:$0xff] %vm21_vm10, %v968_v20  ;;  %1871 = vrcp.f32 %v2851_v19 }
 0x237   :  { %1873 = vpow2.f32 %v766_v12  ;;  %v744_v20 = vmul.f32 1.442695, %v3033_v31  ;;  %v3039_v12 = vld [vmem:[#allocation7_spill] sm:$0xff]  ;;  %v915_v31 = vld [vmem:[#allocation3 + $0x78] sm:$0xff] }
 0x23b   :  { %v1870_v41 = vpop.eup %1869  ;;  %v935_v13 = vpop.xlane.xlu2 %934 }
 0x23c   :  { %v1225_v10 = vmul.f32 0.6931472, %v1870_v41  ;;  %v965_v23 = vadd.f32 %v935_v13, %v917_v54  ;;  %v1872_v9 = vpop.eup %1871  ;;  %v3035_v41 = vld [vmem:[#allocation11_spill] sm:$0xff] }
 0x23d   :  { %v1352_v34 = vmul.f32 %v1872_v9, %v2851_v19  ;;  %v1874_v28 = vpop.eup %1873  ;;  %vm1357_vm7 = vweird.f32 %v1872_v9  ;;  %v3037_v13 = vld [vmem:[#allocation15_spill] sm:$0xff] }
 0x23e   :  { %v1256_v59 = vadd.f32 %v1225_v10, %v1192_v3  ;;  %982 = vst.msk [vmem:[#allocation3 + $0x8] sm:$0xff] %vm21_vm10, %v965_v23  ;;  %v929_v43 = vmul.f32 %v1874_v28, %v913_v38  ;;  %vm1358_vm13 = vmor %vm1356_vm15, %vm1357_vm7  ;;  %v3038_v40 = vsub.f32 %v3037_v13, %v2661_v16  ;;  %v3040_v10 = vld [vmem:[#allocation9_spill] sm:$0xff]  ;;  %v762_v16 = vmul.f32 1.442695, %v735_v62  ;;  %v910_v28 = vld [vmem:[#allocation3 + $0x50] sm:$0xff] }
 0x23f   :  { %v1353_v2 = vsub.f32 1.0, %v1352_v34  ;;  %v3041_v23 = vsub.f32 %v3039_v12, %v3040_v10  ;;  %v1122_v13 = vld [vmem:[#allocation5 + $0x68] sm:$0xff] }
 0x240   :  { %v1304_v17 = vmul.f32 %v2835_v48, %v1256_v59  ;;  %v752_v63 = vmul.f32 1.442695, %v3038_v40  ;;  %v902_v59 = vld [vmem:[#allocation3 + $0x10] sm:$0xff] }
 0x241   :  { %v1354_v48 = vmul.f32 %v1872_v9, %v1353_v2  ;;  %v760_v3 = vmul.f32 1.442695, %v3041_v23  ;;  %v914_v2 = vld [vmem:[#allocation3 + $0x70] sm:$0xff] }
 0x242   :  { %v1320_v14 = vsub.f32 %v1288_v27, %v1304_v17  ;;  %v3042_v17 = vld [vmem:[#allocation13_spill] sm:$0xff] }
 0x243   :  { %v1355_v51 = vadd.f32 %v1872_v9, %v1354_v48  ;;  %v3043_v34 = vsub.f32 %v3042_v17, %v2644_v45 }
 0x244   :  { %v1350_v18 = vmul.f32 %v1349_v33, %v1320_v14 }
 0x245   :  { %v1209_v26 = vld [vmem:[#allocation3 + $0x8] sm:$0xff]  ;;  %v1359_v8 = vsel %vm1358_vm13, %v1872_v9, %v1355_v51  ;;  %v754_v27 = vmul.f32 1.442695, %v3043_v34 }
 0x246   :  { %v1626_v0 = vmul.f32 -1.0, %v1350_v18  ;;  %1875 = vlog2.f32 %v1209_v26  ;;  %v1364_v53 = vsel %vm1361_vm3, %v1363_v44, %v1359_v8  ;;  %v906_v18 = vld [vmem:[#allocation3 + $0x30] sm:$0xff] }
 0x247   :  { %1877 = vpow2.f32 %v758_v37 }
 0x248   :  { %1658 = vst.msk [vmem:[%s2921_s4] sm:$0xff] %vm21_vm10, %v1626_v0  ;;  %1879 = vpow2.f32 %v744_v20  ;;  %v1124_v20 = vld [vmem:[#allocation5 + $0x78] sm:$0xff] }
 0x24a   :  { %v959_v47 = vpop.xlane.xlu2 %958 }
 0x24b   :  { %v977_v46 = vadd.f32 %v959_v47, %v929_v43 }
 0x24c   :  { %v1876_v55 = vpop.eup %1875 }
 0x24d   :  { %v1878_v5 = vpop.eup %1877  ;;  %v1227_v56 = vmul.f32 0.6931472, %v1876_v55  ;;  %994 = vst.msk [vmem:[#allocation3 + $0x68] sm:$0xff] %vm21_vm10, %v977_v46  ;;  %v3046_v46 = vld [vmem:[#allocation17_spill] sm:$0xff]  ;;  %v3047_v55 = vld [vmem:[#allocation18_spill] sm:$0xff] }
 0x24e   :  { %v925_v57 = vmul.f32 %v1878_v5, %v909_v39  ;;  %v1880_v9 = vpop.eup %1879  ;;  %v3048_v52 = vsub.f32 %v3046_v46, %v3047_v55  ;;  %v903_v39 = vld [vmem:[#allocation3 + $0x18] sm:$0xff] }
 0x24f   :  { %v1257_v36 = vadd.f32 %v1227_v56, %v1193_v32  ;;  %v918_v42 = vmul.f32 %v1880_v9, %v902_v59  ;;  %v907_v32 = vld [vmem:[#allocation3 + $0x38] sm:$0xff] }
 0x250   :  { %v770_v5 = vmul.f32 1.442695, %v3048_v52 }
 0x251   :  { %v1305_v6 = vmul.f32 %v2851_v19, %v1257_v36  ;;  %v951_v15 = vpop.xlane.xlu0 %950  ;;  %v3034_v19 = vld [vmem:[#allocation10_spill] sm:$0xff] }
 0x252   :  { %v973_v30 = vadd.f32 %v951_v15, %v925_v57  ;;  %v3036_v4 = vsub.f32 %v3034_v19, %v3035_v41 }
 0x253   :  { %v1321_v24 = vsub.f32 %v1289_v29, %v1305_v6 }
 0x254   :  { %990 = vst.msk [vmem:[#allocation3 + $0x48] sm:$0xff] %vm21_vm10, %v973_v30  ;;  %v768_v61 = vmul.f32 1.442695, %v3036_v4 }
 0x255   :  { %v1365_v58 = vmul.f32 %v1364_v53, %v1321_v24  ;;  %v1123_v24 = vld [vmem:[#allocation5 + $0x70] sm:$0xff] }
 0x256   :  { %1881 = vpow2.f32 %v768_v61 }
 0x257   :  { %v1627_v54 = vmul.f32 -1.0, %v1365_v58  ;;  %1883 = vpow2.f32 %v752_v63 }
 0x258   :  { %1885 = vpow2.f32 %v760_v3 }
 0x259   :  { %1659 = vst.msk [vmem:[%s2921_s4 + $0x8] sm:$0xff] %vm21_vm10, %v1627_v54  ;;  %1887 = vpow2.f32 %v754_v27 }
 0x25a   :  { %1889 = vpow2.f32 %v762_v16 }
 0x25b   :  { %1891 = vpow2.f32 %v746_v21 }
 0x25c   :  { %v1882_v33 = vpop.eup %1881  ;;  %1893 = vpow2.f32 %v770_v5 }
 0x25d   :  { %v1884_v37 = vpop.eup %1883  ;;  %v930_v0 = vmul.f32 %v1882_v33, %v914_v2 }
 0x25e   :  { %v1886_v26 = vpop.eup %1885  ;;  %v922_v45 = vmul.f32 %v1884_v37, %v906_v18 }
 0x25f   :  { %v926_v35 = vmul.f32 %v1886_v26, %v910_v28  ;;  %v1888_v47 = vpop.eup %1887 }
 0x260   :  { %v1890_v51 = vpop.eup %1889  ;;  %v923_v8 = vmul.f32 %v1888_v47, %v907_v32 }
 0x261   :  { %v937_v49 = vpop.xlane.xlu1 %936  ;;  %v1892_v56 = vpop.eup %1891  ;;  %v927_v36 = vmul.f32 %v1890_v51, %v911_v25 }
 0x262   :  { %v966_v14 = vadd.f32 %v937_v49, %v918_v42  ;;  %v919_v44 = vmul.f32 %v1892_v56, %v903_v39  ;;  %v1894_v50 = vpop.eup %1893 }
 0x263   :  { %v931_v53 = vmul.f32 %v1894_v50, %v915_v31 }
 0x264   :  { %983 = vst.msk [vmem:[#allocation3 + $0x10] sm:$0xff] %vm21_vm10, %v966_v14 }
 0x269   :  { %v945_v38 = vpop.xlane.xlu0 %944  ;;  %v961_v1 = vpop.xlane.xlu1 %960 }
 0x26a   :  { %v970_v62 = vadd.f32 %v945_v38, %v922_v45  ;;  %v978_v48 = vadd.f32 %v961_v1, %v930_v0  ;;  %v953_v43 = vpop.xlane.xlu2 %952 }
 0x26b   :  { %v974_v11 = vadd.f32 %v953_v43, %v926_v35 }
 0x26c   :  { %987 = vst.msk [vmem:[#allocation3 + $0x30] sm:$0xff] %vm21_vm10, %v970_v62 }
 0x26d   :  { %995 = vst.msk [vmem:[#allocation3 + $0x70] sm:$0xff] %vm21_vm10, %v978_v48 }
 0x26e   :  { %991 = vst.msk [vmem:[#allocation3 + $0x50] sm:$0xff] %vm21_vm10, %v974_v11 }
 0x271   :  { %v955_v57 = vpop.xlane.xlu1 %954 }
 0x272   :  { %v939_v6 = vpop.xlane.xlu0 %938  ;;  %v975_v15 = vadd.f32 %v955_v57, %v927_v36  ;;  %v947_v29 = vpop.xlane.xlu2 %946 }
 0x273   :  { %v967_v30 = vadd.f32 %v939_v6, %v919_v44  ;;  %v971_v22 = vadd.f32 %v947_v29, %v923_v8 }
 0x274   :  { %992 = vst.msk [vmem:[#allocation3 + $0x58] sm:$0xff] %vm21_vm10, %v975_v15 }
 0x275   :  { %984 = vst.msk [vmem:[#allocation3 + $0x18] sm:$0xff] %vm21_vm10, %v967_v30 }
 0x276   :  { %988 = vst.msk [vmem:[#allocation3 + $0x38] sm:$0xff] %vm21_vm10, %v971_v22 }
 0x279   :  { %v1156_v58 = vpop.xlane.xlu1 %1155 }
 0x27a   :  { %v963_v54 = vpop.xlane.xlu0 %962  ;;  %v1172_v19 = vadd.f32 %v1156_v58, %v1124_v20  ;;  %v1154_v41 = vpop.xlane.xlu2 %1153 }
 0x27b   :  { %v979_v4 = vadd.f32 %v963_v54, %v931_v53  ;;  %v1171_v61 = vadd.f32 %v1154_v41, %v1123_v24 }
 0x27c   :  { %1188 = vst.msk [vmem:[#allocation5 + $0x78] sm:$0xff] %vm21_vm10, %v1172_v19 }
 0x27d   :  { %996 = vst.msk [vmem:[#allocation3 + $0x78] sm:$0xff] %vm21_vm10, %v979_v4 }
 0x27e   :  { %1187 = vst.msk [vmem:[#allocation5 + $0x70] sm:$0xff] %vm21_vm10, %v1171_v61 }
 0x282   :  { %v1152_v40 = vpop.xlane.xlu0 %1151 }
 0x283   :  { %v1170_v63 = vadd.f32 %v1152_v40, %v1122_v13 }
 0x285   :  { %1186 = vst.msk [vmem:[#allocation5 + $0x68] sm:$0xff] %vm21_vm10, %v1170_v63 }

</bundles_post_ra>
